<compile_context>
chip_gen: v7x
topology: tpu7x:2x2x1
jax: 0.10.0
libtpu: 0.0.40
codegen_flags: <defaults>
</compile_context>

<pallas_src>
import jax
import jax.numpy as jnp
from jax import lax
from jax.experimental import pallas as pl
from jax.experimental.pallas import tpu as pltpu


def _make_gru_pred_kernel(T, BP, H, unroll):
    """Build the fused GRU + MLP-head kernel for static (T, BP, H)."""

    def kernel(x_ref,                      # (T*BP, F)  time-major, batch-padded
               wir_ref, wiz_ref, win_ref,  # (F, H)     input->gate weights (W^T)
               whr_ref, whz_ref, whn_ref,  # (H, H)     hidden->gate weights (W^T)
               br_ref, bz_ref,             # (1, H)     b_ih + b_hh folded (r, z)
               bin_ref, bhn_ref,           # (1, H)     n-gate biases (kept split)
               w1_ref, b1_ref,             # (H, H), (1, H)  hidden Linear
               w2_ref, b2_ref,             # (H, 1), (1, 1)  output Linear
               out_ref,                    # (BP, 1)
               gir_s, giz_s, gin_s):       # (T*BP, H) VMEM scratch per gate
        x = x_ref[...]

        # ---- Phase 1: input projections for ALL timesteps, one matmul per gate,
        # biases folded.  This keeps only h @ W_hh on the serial critical path.
        gir_s[...] = (jnp.dot(x, wir_ref[...], preferred_element_type=jnp.float32)
                      + br_ref[...])
        giz_s[...] = (jnp.dot(x, wiz_ref[...], preferred_element_type=jnp.float32)
                      + bz_ref[...])
        gin_s[...] = (jnp.dot(x, win_ref[...], preferred_element_type=jnp.float32)
                      + bin_ref[...])

        # Hoisted out of the loop (JAX does not CSE broadcast_in_dim).
        bhn_b = jnp.broadcast_to(bhn_ref[...], (BP, H))
        whr = whr_ref[...]
        whz = whz_ref[...]
        whn = whn_ref[...]

        # ---- Phase 2: serial GRU recurrence inside one kernel invocation.
        def step(t, h):
            base = pl.multiple_of(t * BP, BP)
            gr = gir_s[pl.ds(base, BP), :]          # (BP, H) sublane-aligned slice
            gz = giz_s[pl.ds(base, BP), :]
            gn = gin_s[pl.ds(base, BP), :]
            hr = jnp.dot(h, whr, preferred_element_type=jnp.float32)
            hz = jnp.dot(h, whz, preferred_element_type=jnp.float32)
            hn = jnp.dot(h, whn, preferred_element_type=jnp.float32)
            r = jax.nn.sigmoid(gr + hr)
            z = jax.nn.sigmoid(gz + hz)
            n = jnp.tanh(gn + r * (hn + bhn_b))
            return (1.0 - z) * n + z * h

        h = lax.fori_loop(0, T, step, jnp.zeros((BP, H), jnp.float32),
                          unroll=unroll)

        # ---- Phase 3: MLP head: relu(Linear) -> sigmoid(Linear).
        hid = jnp.maximum(
            jnp.dot(h, w1_ref[...], preferred_element_type=jnp.float32) + b1_ref[...],
            0.0)
        out = jax.nn.sigmoid(
            jnp.dot(hid, w2_ref[...], preferred_element_type=jnp.float32) + b2_ref[...])
        out_ref[...] = out.astype(out_ref.dtype)

    return kernel


def gru_pred_forward(x, params):
    """x: (B, input_size, seq_len)  -- same layout the PyTorch forward receives."""
    B, F, T = x.shape
    H = params["w_hh"].shape[0]            # w_hh passed as (H, 3H) == W_hh^T
    BP = ((B + 7) // 8) * 8                # pad batch to the 8-row sublane granule

    # --- glue: permute(0,2,1), go time-major, pad batch, flatten time into rows.
    x_tbf = jnp.transpose(x.astype(jnp.float32), (2, 0, 1))      # (T, B, F)
    x_tbf = jnp.pad(x_tbf, ((0, 0), (0, BP - B), (0, 0)))        # (T, BP, F)
    x2d = x_tbf.reshape(T * BP, F)

    # --- glue: split fused gate weights per gate, fold biases where legal.
    w_ih, w_hh = params["w_ih"], params["w_hh"]                  # (F,3H), (H,3H)
    b_ih, b_hh = params["b_ih"], params["b_hh"]                  # (1,3H)
    wir, wiz, win = w_ih[:, :H], w_ih[:, H:2 * H], w_ih[:, 2 * H:]
    whr, whz, whn = w_hh[:, :H], w_hh[:, H:2 * H], w_hh[:, 2 * H:]
    br = b_ih[:, :H] + b_hh[:, :H]                 # r gate: both biases fold
    bz = b_ih[:, H:2 * H] + b_hh[:, H:2 * H]       # z gate: both biases fold
    bin_ = b_ih[:, 2 * H:]                         # n gate: must stay split
    bhn = b_hh[:, 2 * H:]                          # (inside the r*(...) term)

    kernel = _make_gru_pred_kernel(T, BP, H, unroll=(T <= 32))
    vmem = pl.BlockSpec(memory_space=pltpu.MemorySpace.VMEM)

    # TODO(synk): for very long sequences, chunk T (grid over T-chunks) instead
    # of holding the whole sequence in VMEM; at these sizes it is KBs.
    out = pl.pallas_call(
        kernel,
        out_shape=jax.ShapeDtypeStruct((BP, 1), jnp.float32),
        in_specs=[vmem] * 15,
        out_specs=vmem,
        scratch_shapes=[pltpu.VMEM((T * BP, H), jnp.float32)] * 3,
    )(x2d, wir, wiz, win, whr, whz, whn, br, bz, bin_, bhn,
      params["w1"], params["b1"], params["w2"], params["b2"])
    return out[:B]


def gru_pred_reference(x, params):
    """Pure-JAX reference for correctness check."""
    x = jnp.transpose(x.astype(jnp.float32), (0, 2, 1))   # (B, T, F)
    B, T, F = x.shape
    H = params["w_hh"].shape[1] // 3
    h = jnp.zeros((B, H), jnp.float32)
    for t in range(T):
        gi = x[:, t, :] @ params["w_ih"] + params["b_ih"]
        gh = h @ params["w_hh"] + params["b_hh"]
        r = jax.nn.sigmoid(gi[:, :H] + gh[:, :H])
        z = jax.nn.sigmoid(gi[:, H:2 * H] + gh[:, H:2 * H])
        n = jnp.tanh(gi[:, 2 * H:] + r * gh[:, 2 * H:])
        h = (1.0 - z) * n + z * h
    hid = jnp.maximum(h @ params["w1"] + params["b1"], 0.0)
    return jax.nn.sigmoid(hid @ params["w2"] + params["b2"])


def init_params(key, input_size, hidden_size):
    ks = jax.random.split(key, 8)
    s = 0.1
    H, F = hidden_size, input_size
    return {
        "w_ih": s * jax.random.normal(ks[0], (F, 3 * H), jnp.float32),
        "w_hh": s * jax.random.normal(ks[1], (H, 3 * H), jnp.float32),
        "b_ih": s * jax.random.normal(ks[2], (1, 3 * H), jnp.float32),
        "b_hh": s * jax.random.normal(ks[3], (1, 3 * H), jnp.float32),
        "w1":   s * jax.random.normal(ks[4], (H, H), jnp.float32),
        "b1":   s * jax.random.normal(ks[5], (1, H), jnp.float32),
        "w2":   s * jax.random.normal(ks[6], (H, 1), jnp.float32),
        "b2":   s * jax.random.normal(ks[7], (1, 1), jnp.float32),
    }


if __name__ == "__main__":
    B, input_size, seq_len, hidden_size = 2, 4, 8, 32
    key = jax.random.PRNGKey(0)
    k_x, k_p = jax.random.split(key)
    # forward() receives (B, input_size, seq_len) and permutes internally
    x = jax.random.normal(k_x, (B, input_size, seq_len), jnp.float32)
    params = init_params(k_p, input_size, hidden_size)

    out = gru_pred_forward(x, params)
    out = jax.block_until_ready(out)

    ref = gru_pred_reference(x, params)
    assert out.shape == (B, 1)
    assert jnp.allclose(out, ref, atol=1e-5, rtol=1e-5), (out, ref)
    print("KERNEL_OK")
</pallas_src>

<mosaic_0001>
module attributes {stable_mosaic.version = 11 : i64} {
  func.func @kernel(%arg0: memref<64x4xf32, #tpu.memory_space<vmem>>, %arg1: memref<4x32xf32, #tpu.memory_space<vmem>>, %arg2: memref<4x32xf32, #tpu.memory_space<vmem>>, %arg3: memref<4x32xf32, #tpu.memory_space<vmem>>, %arg4: memref<32x32xf32, #tpu.memory_space<vmem>>, %arg5: memref<32x32xf32, #tpu.memory_space<vmem>>, %arg6: memref<32x32xf32, #tpu.memory_space<vmem>>, %arg7: memref<1x32xf32, #tpu.memory_space<vmem>>, %arg8: memref<1x32xf32, #tpu.memory_space<vmem>>, %arg9: memref<1x32xf32, #tpu.memory_space<vmem>>, %arg10: memref<1x32xf32, #tpu.memory_space<vmem>>, %arg11: memref<32x32xf32, #tpu.memory_space<vmem>>, %arg12: memref<1x32xf32, #tpu.memory_space<vmem>>, %arg13: memref<32x1xf32, #tpu.memory_space<vmem>>, %arg14: memref<1x1xf32, #tpu.memory_space<vmem>>, %arg15: memref<8x1xf32, #tpu.memory_space<vmem>>, %arg16: memref<64x32xf32, #tpu.memory_space<vmem>>, %arg17: memref<64x32xf32, #tpu.memory_space<vmem>>, %arg18: memref<64x32xf32, #tpu.memory_space<vmem>>) attributes {dimension_semantics = [], scalar_prefetch = 0 : i64, scratch_operands = 3 : i64, tpu.core_type = #tpu.core_type<tc>} {
    %c0 = arith.constant 0 : index
    %c0_0 = arith.constant 0 : index
    %0 = vector.load %arg0[%c0, %c0_0] : memref<64x4xf32, #tpu.memory_space<vmem>>, vector<64x4xf32>
    %c0_1 = arith.constant 0 : index
    %c0_2 = arith.constant 0 : index
    %1 = vector.load %arg1[%c0_1, %c0_2] : memref<4x32xf32, #tpu.memory_space<vmem>>, vector<4x32xf32>
    %cst = arith.constant dense<0.000000e+00> : vector<64x32xf32>
    %2 = tpu.matmul %0, %1, %cst {dimension_numbers = #tpu.dot_dimension_numbers<[1], [0], [0], [1], [0, 0, 1, 1], [], []>} : vector<64x4xf32>, vector<4x32xf32>, vector<64x32xf32> -> vector<64x32xf32>
    %c0_3 = arith.constant 0 : index
    %c0_4 = arith.constant 0 : index
    %3 = vector.load %arg7[%c0_3, %c0_4] : memref<1x32xf32, #tpu.memory_space<vmem>>, vector<1x32xf32>
    %4 = vector.broadcast %3 : vector<1x32xf32> to vector<64x32xf32>
    %5 = arith.addf %2, %4 : vector<64x32xf32>
    %c0_5 = arith.constant 0 : index
    %c0_6 = arith.constant 0 : index
    %6 = vector.load %arg16[%c0_5, %c0_6] : memref<64x32xf32, #tpu.memory_space<vmem>>, vector<64x32xf32>
    tpu.vector_store %arg16[%c0_5, %c0_6], %5 {strides = array<i32>} : memref<64x32xf32, #tpu.memory_space<vmem>>, vector<64x32xf32>,
    %c0_7 = arith.constant 0 : index
    %c0_8 = arith.constant 0 : index
    %7 = vector.load %arg2[%c0_7, %c0_8] : memref<4x32xf32, #tpu.memory_space<vmem>>, vector<4x32xf32>
    %cst_9 = arith.constant dense<0.000000e+00> : vector<64x32xf32>
    %8 = tpu.matmul %0, %7, %cst_9 {dimension_numbers = #tpu.dot_dimension_numbers<[1], [0], [0], [1], [0, 0, 1, 1], [], []>} : vector<64x4xf32>, vector<4x32xf32>, vector<64x32xf32> -> vector<64x32xf32>
    %c0_10 = arith.constant 0 : index
    %c0_11 = arith.constant 0 : index
    %9 = vector.load %arg8[%c0_10, %c0_11] : memref<1x32xf32, #tpu.memory_space<vmem>>, vector<1x32xf32>
    %10 = vector.broadcast %9 : vector<1x32xf32> to vector<64x32xf32>
    %11 = arith.addf %8, %10 : vector<64x32xf32>
    %c0_12 = arith.constant 0 : index
    %c0_13 = arith.constant 0 : index
    %12 = vector.load %arg17[%c0_12, %c0_13] : memref<64x32xf32, #tpu.memory_space<vmem>>, vector<64x32xf32>
    tpu.vector_store %arg17[%c0_12, %c0_13], %11 {strides = array<i32>} : memref<64x32xf32, #tpu.memory_space<vmem>>, vector<64x32xf32>,
    %c0_14 = arith.constant 0 : index
    %c0_15 = arith.constant 0 : index
    %13 = vector.load %arg3[%c0_14, %c0_15] : memref<4x32xf32, #tpu.memory_space<vmem>>, vector<4x32xf32>
    %cst_16 = arith.constant dense<0.000000e+00> : vector<64x32xf32>
    %14 = tpu.matmul %0, %13, %cst_16 {dimension_numbers = #tpu.dot_dimension_numbers<[1], [0], [0], [1], [0, 0, 1, 1], [], []>} : vector<64x4xf32>, vector<4x32xf32>, vector<64x32xf32> -> vector<64x32xf32>
    %c0_17 = arith.constant 0 : index
    %c0_18 = arith.constant 0 : index
    %15 = vector.load %arg9[%c0_17, %c0_18] : memref<1x32xf32, #tpu.memory_space<vmem>>, vector<1x32xf32>
    %16 = vector.broadcast %15 : vector<1x32xf32> to vector<64x32xf32>
    %17 = arith.addf %14, %16 : vector<64x32xf32>
    %c0_19 = arith.constant 0 : index
    %c0_20 = arith.constant 0 : index
    %18 = vector.load %arg18[%c0_19, %c0_20] : memref<64x32xf32, #tpu.memory_space<vmem>>, vector<64x32xf32>
    tpu.vector_store %arg18[%c0_19, %c0_20], %17 {strides = array<i32>} : memref<64x32xf32, #tpu.memory_space<vmem>>, vector<64x32xf32>,
    %c0_21 = arith.constant 0 : index
    %c0_22 = arith.constant 0 : index
    %19 = vector.load %arg10[%c0_21, %c0_22] : memref<1x32xf32, #tpu.memory_space<vmem>>, vector<1x32xf32>
    %20 = vector.shape_cast %19 : vector<1x32xf32> to vector<1x32xf32>
    %21 = vector.broadcast %20 : vector<1x32xf32> to vector<8x32xf32>
    %c0_23 = arith.constant 0 : index
    %c0_24 = arith.constant 0 : index
    %22 = vector.load %arg4[%c0_23, %c0_24] : memref<32x32xf32, #tpu.memory_space<vmem>>, vector<32x32xf32>
    %c0_25 = arith.constant 0 : index
    %c0_26 = arith.constant 0 : index
    %23 = vector.load %arg5[%c0_25, %c0_26] : memref<32x32xf32, #tpu.memory_space<vmem>>, vector<32x32xf32>
    %c0_27 = arith.constant 0 : index
    %c0_28 = arith.constant 0 : index
    %24 = vector.load %arg6[%c0_27, %c0_28] : memref<32x32xf32, #tpu.memory_space<vmem>>, vector<32x32xf32>
    %cst_29 = arith.constant 0.000000e+00 : f32
    %25 = vector.broadcast %cst_29 : f32 to vector<8x32xf32>
    %c0_i32 = arith.constant 0 : i32
    %c8_i32 = arith.constant 8 : i32
    %26 = arith.muli %c0_i32, %c8_i32 : i32
    %27 = tpu.assume_multiple %26, 8 : i32
    %28 = arith.index_cast %27 : i32 to index
    %c0_30 = arith.constant 0 : index
    %29 = vector.load %arg16[%28, %c0_30] : memref<64x32xf32, #tpu.memory_space<vmem>>, vector<8x32xf32>
    %30 = arith.index_cast %27 : i32 to index
    %c0_31 = arith.constant 0 : index
    %31 = vector.load %arg17[%30, %c0_31] : memref<64x32xf32, #tpu.memory_space<vmem>>, vector<8x32xf32>
    %32 = arith.index_cast %27 : i32 to index
    %c0_32 = arith.constant 0 : index
    %33 = vector.load %arg18[%32, %c0_32] : memref<64x32xf32, #tpu.memory_space<vmem>>, vector<8x32xf32>
    %cst_33 = arith.constant dense<0.000000e+00> : vector<8x32xf32>
    %34 = tpu.matmul %25, %22, %cst_33 {dimension_numbers = #tpu.dot_dimension_numbers<[1], [0], [0], [1], [0, 0, 1, 1], [], []>} : vector<8x32xf32>, vector<32x32xf32>, vector<8x32xf32> -> vector<8x32xf32>
    %cst_34 = arith.constant dense<0.000000e+00> : vector<8x32xf32>
    %35 = tpu.matmul %25, %23, %cst_34 {dimension_numbers = #tpu.dot_dimension_numbers<[1], [0], [0], [1], [0, 0, 1, 1], [], []>} : vector<8x32xf32>, vector<32x32xf32>, vector<8x32xf32> -> vector<8x32xf32>
    %cst_35 = arith.constant dense<0.000000e+00> : vector<8x32xf32>
    %36 = tpu.matmul %25, %24, %cst_35 {dimension_numbers = #tpu.dot_dimension_numbers<[1], [0], [0], [1], [0, 0, 1, 1], [], []>} : vector<8x32xf32>, vector<32x32xf32>, vector<8x32xf32> -> vector<8x32xf32>
    %37 = arith.addf %29, %34 : vector<8x32xf32>
    %38 = arith.negf %37 : vector<8x32xf32>
    %39 = math.exp %38 : vector<8x32xf32>
    %cst_36 = arith.constant 1.000000e+00 : f32
    %40 = vector.broadcast %cst_36 : f32 to vector<8x32xf32>
    %41 = arith.addf %40, %39 : vector<8x32xf32>
    %42 = arith.divf %40, %41 : vector<8x32xf32>
    %43 = arith.addf %31, %35 : vector<8x32xf32>
    %44 = arith.negf %43 : vector<8x32xf32>
    %45 = math.exp %44 : vector<8x32xf32>
    %cst_37 = arith.constant 1.000000e+00 : f32
    %46 = vector.broadcast %cst_37 : f32 to vector<8x32xf32>
    %47 = arith.addf %46, %45 : vector<8x32xf32>
    %48 = arith.divf %46, %47 : vector<8x32xf32>
    %49 = arith.addf %36, %21 : vector<8x32xf32>
    %50 = arith.mulf %42, %49 : vector<8x32xf32>
    %51 = arith.addf %33, %50 : vector<8x32xf32>
    %52 = math.tanh %51 : vector<8x32xf32>
    %cst_38 = arith.constant 1.000000e+00 : f32
    %53 = vector.broadcast %cst_38 : f32 to vector<8x32xf32>
    %54 = arith.subf %53, %48 : vector<8x32xf32>
    %55 = arith.mulf %54, %52 : vector<8x32xf32>
    %56 = arith.mulf %48, %25 : vector<8x32xf32>
    %57 = arith.addf %55, %56 : vector<8x32xf32>
    %c1_i32 = arith.constant 1 : i32
    %c8_i32_39 = arith.constant 8 : i32
    %58 = arith.muli %c1_i32, %c8_i32_39 : i32
    %59 = tpu.assume_multiple %58, 8 : i32
    %60 = arith.index_cast %59 : i32 to index
    %c0_40 = arith.constant 0 : index
    %61 = vector.load %arg16[%60, %c0_40] : memref<64x32xf32, #tpu.memory_space<vmem>>, vector<8x32xf32>
    %62 = arith.index_cast %59 : i32 to index
    %c0_41 = arith.constant 0 : index
    %63 = vector.load %arg17[%62, %c0_41] : memref<64x32xf32, #tpu.memory_space<vmem>>, vector<8x32xf32>
    %64 = arith.index_cast %59 : i32 to index
    %c0_42 = arith.constant 0 : index
    %65 = vector.load %arg18[%64, %c0_42] : memref<64x32xf32, #tpu.memory_space<vmem>>, vector<8x32xf32>
    %cst_43 = arith.constant dense<0.000000e+00> : vector<8x32xf32>
    %66 = tpu.matmul %57, %22, %cst_43 {dimension_numbers = #tpu.dot_dimension_numbers<[1], [0], [0], [1], [0, 0, 1, 1], [], []>} : vector<8x32xf32>, vector<32x32xf32>, vector<8x32xf32> -> vector<8x32xf32>
    %cst_44 = arith.constant dense<0.000000e+00> : vector<8x32xf32>
    %67 = tpu.matmul %57, %23, %cst_44 {dimension_numbers = #tpu.dot_dimension_numbers<[1], [0], [0], [1], [0, 0, 1, 1], [], []>} : vector<8x32xf32>, vector<32x32xf32>, vector<8x32xf32> -> vector<8x32xf32>
    %cst_45 = arith.constant dense<0.000000e+00> : vector<8x32xf32>
    %68 = tpu.matmul %57, %24, %cst_45 {dimension_numbers = #tpu.dot_dimension_numbers<[1], [0], [0], [1], [0, 0, 1, 1], [], []>} : vector<8x32xf32>, vector<32x32xf32>, vector<8x32xf32> -> vector<8x32xf32>
    %69 = arith.addf %61, %66 : vector<8x32xf32>
    %70 = arith.negf %69 : vector<8x32xf32>
    %71 = math.exp %70 : vector<8x32xf32>
    %cst_46 = arith.constant 1.000000e+00 : f32
    %72 = vector.broadcast %cst_46 : f32 to vector<8x32xf32>
    %73 = arith.addf %72, %71 : vector<8x32xf32>
    %74 = arith.divf %72, %73 : vector<8x32xf32>
    %75 = arith.addf %63, %67 : vector<8x32xf32>
    %76 = arith.negf %75 : vector<8x32xf32>
    %77 = math.exp %76 : vector<8x32xf32>
    %cst_47 = arith.constant 1.000000e+00 : f32
    %78 = vector.broadcast %cst_47 : f32 to vector<8x32xf32>
    %79 = arith.addf %78, %77 : vector<8x32xf32>
    %80 = arith.divf %78, %79 : vector<8x32xf32>
    %81 = arith.addf %68, %21 : vector<8x32xf32>
    %82 = arith.mulf %74, %81 : vector<8x32xf32>
    %83 = arith.addf %65, %82 : vector<8x32xf32>
    %84 = math.tanh %83 : vector<8x32xf32>
    %cst_48 = arith.constant 1.000000e+00 : f32
    %85 = vector.broadcast %cst_48 : f32 to vector<8x32xf32>
    %86 = arith.subf %85, %80 : vector<8x32xf32>
    %87 = arith.mulf %86, %84 : vector<8x32xf32>
    %88 = arith.mulf %80, %57 : vector<8x32xf32>
    %89 = arith.addf %87, %88 : vector<8x32xf32>
    %c2_i32 = arith.constant 2 : i32
    %c8_i32_49 = arith.constant 8 : i32
    %90 = arith.muli %c2_i32, %c8_i32_49 : i32
    %91 = tpu.assume_multiple %90, 8 : i32
    %92 = arith.index_cast %91 : i32 to index
    %c0_50 = arith.constant 0 : index
    %93 = vector.load %arg16[%92, %c0_50] : memref<64x32xf32, #tpu.memory_space<vmem>>, vector<8x32xf32>
    %94 = arith.index_cast %91 : i32 to index
    %c0_51 = arith.constant 0 : index
    %95 = vector.load %arg17[%94, %c0_51] : memref<64x32xf32, #tpu.memory_space<vmem>>, vector<8x32xf32>
    %96 = arith.index_cast %91 : i32 to index
    %c0_52 = arith.constant 0 : index
    %97 = vector.load %arg18[%96, %c0_52] : memref<64x32xf32, #tpu.memory_space<vmem>>, vector<8x32xf32>
    %cst_53 = arith.constant dense<0.000000e+00> : vector<8x32xf32>
    %98 = tpu.matmul %89, %22, %cst_53 {dimension_numbers = #tpu.dot_dimension_numbers<[1], [0], [0], [1], [0, 0, 1, 1], [], []>} : vector<8x32xf32>, vector<32x32xf32>, vector<8x32xf32> -> vector<8x32xf32>
    %cst_54 = arith.constant dense<0.000000e+00> : vector<8x32xf32>
    %99 = tpu.matmul %89, %23, %cst_54 {dimension_numbers = #tpu.dot_dimension_numbers<[1], [0], [0], [1], [0, 0, 1, 1], [], []>} : vector<8x32xf32>, vector<32x32xf32>, vector<8x32xf32> -> vector<8x32xf32>
    %cst_55 = arith.constant dense<0.000000e+00> : vector<8x32xf32>
    %100 = tpu.matmul %89, %24, %cst_55 {dimension_numbers = #tpu.dot_dimension_numbers<[1], [0], [0], [1], [0, 0, 1, 1], [], []>} : vector<8x32xf32>, vector<32x32xf32>, vector<8x32xf32> -> vector<8x32xf32>
    %101 = arith.addf %93, %98 : vector<8x32xf32>
    %102 = arith.negf %101 : vector<8x32xf32>
    %103 = math.exp %102 : vector<8x32xf32>
    %cst_56 = arith.constant 1.000000e+00 : f32
    %104 = vector.broadcast %cst_56 : f32 to vector<8x32xf32>
    %105 = arith.addf %104, %103 : vector<8x32xf32>
    %106 = arith.divf %104, %105 : vector<8x32xf32>
    %107 = arith.addf %95, %99 : vector<8x32xf32>
    %108 = arith.negf %107 : vector<8x32xf32>
    %109 = math.exp %108 : vector<8x32xf32>
    %cst_57 = arith.constant 1.000000e+00 : f32
    %110 = vector.broadcast %cst_57 : f32 to vector<8x32xf32>
    %111 = arith.addf %110, %109 : vector<8x32xf32>
    %112 = arith.divf %110, %111 : vector<8x32xf32>
    %113 = arith.addf %100, %21 : vector<8x32xf32>
    %114 = arith.mulf %106, %113 : vector<8x32xf32>
    %115 = arith.addf %97, %114 : vector<8x32xf32>
    %116 = math.tanh %115 : vector<8x32xf32>
    %cst_58 = arith.constant 1.000000e+00 : f32
    %117 = vector.broadcast %cst_58 : f32 to vector<8x32xf32>
    %118 = arith.subf %117, %112 : vector<8x32xf32>
    %119 = arith.mulf %118, %116 : vector<8x32xf32>
    %120 = arith.mulf %112, %89 : vector<8x32xf32>
    %121 = arith.addf %119, %120 : vector<8x32xf32>
    %c3_i32 = arith.constant 3 : i32
    %c8_i32_59 = arith.constant 8 : i32
    %122 = arith.muli %c3_i32, %c8_i32_59 : i32
    %123 = tpu.assume_multiple %122, 8 : i32
    %124 = arith.index_cast %123 : i32 to index
    %c0_60 = arith.constant 0 : index
    %125 = vector.load %arg16[%124, %c0_60] : memref<64x32xf32, #tpu.memory_space<vmem>>, vector<8x32xf32>
    %126 = arith.index_cast %123 : i32 to index
    %c0_61 = arith.constant 0 : index
    %127 = vector.load %arg17[%126, %c0_61] : memref<64x32xf32, #tpu.memory_space<vmem>>, vector<8x32xf32>
    %128 = arith.index_cast %123 : i32 to index
    %c0_62 = arith.constant 0 : index
    %129 = vector.load %arg18[%128, %c0_62] : memref<64x32xf32, #tpu.memory_space<vmem>>, vector<8x32xf32>
    %cst_63 = arith.constant dense<0.000000e+00> : vector<8x32xf32>
    %130 = tpu.matmul %121, %22, %cst_63 {dimension_numbers = #tpu.dot_dimension_numbers<[1], [0], [0], [1], [0, 0, 1, 1], [], []>} : vector<8x32xf32>, vector<32x32xf32>, vector<8x32xf32> -> vector<8x32xf32>
    %cst_64 = arith.constant dense<0.000000e+00> : vector<8x32xf32>
    %131 = tpu.matmul %121, %23, %cst_64 {dimension_numbers = #tpu.dot_dimension_numbers<[1], [0], [0], [1], [0, 0, 1, 1], [], []>} : vector<8x32xf32>, vector<32x32xf32>, vector<8x32xf32> -> vector<8x32xf32>
    %cst_65 = arith.constant dense<0.000000e+00> : vector<8x32xf32>
    %132 = tpu.matmul %121, %24, %cst_65 {dimension_numbers = #tpu.dot_dimension_numbers<[1], [0], [0], [1], [0, 0, 1, 1], [], []>} : vector<8x32xf32>, vector<32x32xf32>, vector<8x32xf32> -> vector<8x32xf32>
    %133 = arith.addf %125, %130 : vector<8x32xf32>
    %134 = arith.negf %133 : vector<8x32xf32>
    %135 = math.exp %134 : vector<8x32xf32>
    %cst_66 = arith.constant 1.000000e+00 : f32
    %136 = vector.broadcast %cst_66 : f32 to vector<8x32xf32>
    %137 = arith.addf %136, %135 : vector<8x32xf32>
    %138 = arith.divf %136, %137 : vector<8x32xf32>
    %139 = arith.addf %127, %131 : vector<8x32xf32>
    %140 = arith.negf %139 : vector<8x32xf32>
    %141 = math.exp %140 : vector<8x32xf32>
    %cst_67 = arith.constant 1.000000e+00 : f32
    %142 = vector.broadcast %cst_67 : f32 to vector<8x32xf32>
    %143 = arith.addf %142, %141 : vector<8x32xf32>
    %144 = arith.divf %142, %143 : vector<8x32xf32>
    %145 = arith.addf %132, %21 : vector<8x32xf32>
    %146 = arith.mulf %138, %145 : vector<8x32xf32>
    %147 = arith.addf %129, %146 : vector<8x32xf32>
    %148 = math.tanh %147 : vector<8x32xf32>
    %cst_68 = arith.constant 1.000000e+00 : f32
    %149 = vector.broadcast %cst_68 : f32 to vector<8x32xf32>
    %150 = arith.subf %149, %144 : vector<8x32xf32>
    %151 = arith.mulf %150, %148 : vector<8x32xf32>
    %152 = arith.mulf %144, %121 : vector<8x32xf32>
    %153 = arith.addf %151, %152 : vector<8x32xf32>
    %c4_i32 = arith.constant 4 : i32
    %c8_i32_69 = arith.constant 8 : i32
    %154 = arith.muli %c4_i32, %c8_i32_69 : i32
    %155 = tpu.assume_multiple %154, 8 : i32
    %156 = arith.index_cast %155 : i32 to index
    %c0_70 = arith.constant 0 : index
    %157 = vector.load %arg16[%156, %c0_70] : memref<64x32xf32, #tpu.memory_space<vmem>>, vector<8x32xf32>
    %158 = arith.index_cast %155 : i32 to index
    %c0_71 = arith.constant 0 : index
    %159 = vector.load %arg17[%158, %c0_71] : memref<64x32xf32, #tpu.memory_space<vmem>>, vector<8x32xf32>
    %160 = arith.index_cast %155 : i32 to index
    %c0_72 = arith.constant 0 : index
    %161 = vector.load %arg18[%160, %c0_72] : memref<64x32xf32, #tpu.memory_space<vmem>>, vector<8x32xf32>
    %cst_73 = arith.constant dense<0.000000e+00> : vector<8x32xf32>
    %162 = tpu.matmul %153, %22, %cst_73 {dimension_numbers = #tpu.dot_dimension_numbers<[1], [0], [0], [1], [0, 0, 1, 1], [], []>} : vector<8x32xf32>, vector<32x32xf32>, vector<8x32xf32> -> vector<8x32xf32>
    %cst_74 = arith.constant dense<0.000000e+00> : vector<8x32xf32>
    %163 = tpu.matmul %153, %23, %cst_74 {dimension_numbers = #tpu.dot_dimension_numbers<[1], [0], [0], [1], [0, 0, 1, 1], [], []>} : vector<8x32xf32>, vector<32x32xf32>, vector<8x32xf32> -> vector<8x32xf32>
    %cst_75 = arith.constant dense<0.000000e+00> : vector<8x32xf32>
    %164 = tpu.matmul %153, %24, %cst_75 {dimension_numbers = #tpu.dot_dimension_numbers<[1], [0], [0], [1], [0, 0, 1, 1], [], []>} : vector<8x32xf32>, vector<32x32xf32>, vector<8x32xf32> -> vector<8x32xf32>
    %165 = arith.addf %157, %162 : vector<8x32xf32>
    %166 = arith.negf %165 : vector<8x32xf32>
    %167 = math.exp %166 : vector<8x32xf32>
    %cst_76 = arith.constant 1.000000e+00 : f32
    %168 = vector.broadcast %cst_76 : f32 to vector<8x32xf32>
    %169 = arith.addf %168, %167 : vector<8x32xf32>
    %170 = arith.divf %168, %169 : vector<8x32xf32>
    %171 = arith.addf %159, %163 : vector<8x32xf32>
    %172 = arith.negf %171 : vector<8x32xf32>
    %173 = math.exp %172 : vector<8x32xf32>
    %cst_77 = arith.constant 1.000000e+00 : f32
    %174 = vector.broadcast %cst_77 : f32 to vector<8x32xf32>
    %175 = arith.addf %174, %173 : vector<8x32xf32>
    %176 = arith.divf %174, %175 : vector<8x32xf32>
    %177 = arith.addf %164, %21 : vector<8x32xf32>
    %178 = arith.mulf %170, %177 : vector<8x32xf32>
    %179 = arith.addf %161, %178 : vector<8x32xf32>
    %180 = math.tanh %179 : vector<8x32xf32>
    %cst_78 = arith.constant 1.000000e+00 : f32
    %181 = vector.broadcast %cst_78 : f32 to vector<8x32xf32>
    %182 = arith.subf %181, %176 : vector<8x32xf32>
    %183 = arith.mulf %182, %180 : vector<8x32xf32>
    %184 = arith.mulf %176, %153 : vector<8x32xf32>
    %185 = arith.addf %183, %184 : vector<8x32xf32>
    %c5_i32 = arith.constant 5 : i32
    %c8_i32_79 = arith.constant 8 : i32
    %186 = arith.muli %c5_i32, %c8_i32_79 : i32
    %187 = tpu.assume_multiple %186, 8 : i32
    %188 = arith.index_cast %187 : i32 to index
    %c0_80 = arith.constant 0 : index
    %189 = vector.load %arg16[%188, %c0_80] : memref<64x32xf32, #tpu.memory_space<vmem>>, vector<8x32xf32>
    %190 = arith.index_cast %187 : i32 to index
    %c0_81 = arith.constant 0 : index
    %191 = vector.load %arg17[%190, %c0_81] : memref<64x32xf32, #tpu.memory_space<vmem>>, vector<8x32xf32>
    %192 = arith.index_cast %187 : i32 to index
    %c0_82 = arith.constant 0 : index
    %193 = vector.load %arg18[%192, %c0_82] : memref<64x32xf32, #tpu.memory_space<vmem>>, vector<8x32xf32>
    %cst_83 = arith.constant dense<0.000000e+00> : vector<8x32xf32>
    %194 = tpu.matmul %185, %22, %cst_83 {dimension_numbers = #tpu.dot_dimension_numbers<[1], [0], [0], [1], [0, 0, 1, 1], [], []>} : vector<8x32xf32>, vector<32x32xf32>, vector<8x32xf32> -> vector<8x32xf32>
    %cst_84 = arith.constant dense<0.000000e+00> : vector<8x32xf32>
    %195 = tpu.matmul %185, %23, %cst_84 {dimension_numbers = #tpu.dot_dimension_numbers<[1], [0], [0], [1], [0, 0, 1, 1], [], []>} : vector<8x32xf32>, vector<32x32xf32>, vector<8x32xf32> -> vector<8x32xf32>
    %cst_85 = arith.constant dense<0.000000e+00> : vector<8x32xf32>
    %196 = tpu.matmul %185, %24, %cst_85 {dimension_numbers = #tpu.dot_dimension_numbers<[1], [0], [0], [1], [0, 0, 1, 1], [], []>} : vector<8x32xf32>, vector<32x32xf32>, vector<8x32xf32> -> vector<8x32xf32>
    %197 = arith.addf %189, %194 : vector<8x32xf32>
    %198 = arith.negf %197 : vector<8x32xf32>
    %199 = math.exp %198 : vector<8x32xf32>
    %cst_86 = arith.constant 1.000000e+00 : f32
    %200 = vector.broadcast %cst_86 : f32 to vector<8x32xf32>
    %201 = arith.addf %200, %199 : vector<8x32xf32>
    %202 = arith.divf %200, %201 : vector<8x32xf32>
    %203 = arith.addf %191, %195 : vector<8x32xf32>
    %204 = arith.negf %203 : vector<8x32xf32>
    %205 = math.exp %204 : vector<8x32xf32>
    %cst_87 = arith.constant 1.000000e+00 : f32
    %206 = vector.broadcast %cst_87 : f32 to vector<8x32xf32>
    %207 = arith.addf %206, %205 : vector<8x32xf32>
    %208 = arith.divf %206, %207 : vector<8x32xf32>
    %209 = arith.addf %196, %21 : vector<8x32xf32>
    %210 = arith.mulf %202, %209 : vector<8x32xf32>
    %211 = arith.addf %193, %210 : vector<8x32xf32>
    %212 = math.tanh %211 : vector<8x32xf32>
    %cst_88 = arith.constant 1.000000e+00 : f32
    %213 = vector.broadcast %cst_88 : f32 to vector<8x32xf32>
    %214 = arith.subf %213, %208 : vector<8x32xf32>
    %215 = arith.mulf %214, %212 : vector<8x32xf32>
    %216 = arith.mulf %208, %185 : vector<8x32xf32>
    %217 = arith.addf %215, %216 : vector<8x32xf32>
    %c6_i32 = arith.constant 6 : i32
    %c8_i32_89 = arith.constant 8 : i32
    %218 = arith.muli %c6_i32, %c8_i32_89 : i32
    %219 = tpu.assume_multiple %218, 8 : i32
    %220 = arith.index_cast %219 : i32 to index
    %c0_90 = arith.constant 0 : index
    %221 = vector.load %arg16[%220, %c0_90] : memref<64x32xf32, #tpu.memory_space<vmem>>, vector<8x32xf32>
    %222 = arith.index_cast %219 : i32 to index
    %c0_91 = arith.constant 0 : index
    %223 = vector.load %arg17[%222, %c0_91] : memref<64x32xf32, #tpu.memory_space<vmem>>, vector<8x32xf32>
    %224 = arith.index_cast %219 : i32 to index
    %c0_92 = arith.constant 0 : index
    %225 = vector.load %arg18[%224, %c0_92] : memref<64x32xf32, #tpu.memory_space<vmem>>, vector<8x32xf32>
    %cst_93 = arith.constant dense<0.000000e+00> : vector<8x32xf32>
    %226 = tpu.matmul %217, %22, %cst_93 {dimension_numbers = #tpu.dot_dimension_numbers<[1], [0], [0], [1], [0, 0, 1, 1], [], []>} : vector<8x32xf32>, vector<32x32xf32>, vector<8x32xf32> -> vector<8x32xf32>
    %cst_94 = arith.constant dense<0.000000e+00> : vector<8x32xf32>
    %227 = tpu.matmul %217, %23, %cst_94 {dimension_numbers = #tpu.dot_dimension_numbers<[1], [0], [0], [1], [0, 0, 1, 1], [], []>} : vector<8x32xf32>, vector<32x32xf32>, vector<8x32xf32> -> vector<8x32xf32>
    %cst_95 = arith.constant dense<0.000000e+00> : vector<8x32xf32>
    %228 = tpu.matmul %217, %24, %cst_95 {dimension_numbers = #tpu.dot_dimension_numbers<[1], [0], [0], [1], [0, 0, 1, 1], [], []>} : vector<8x32xf32>, vector<32x32xf32>, vector<8x32xf32> -> vector<8x32xf32>
    %229 = arith.addf %221, %226 : vector<8x32xf32>
    %230 = arith.negf %229 : vector<8x32xf32>
    %231 = math.exp %230 : vector<8x32xf32>
    %cst_96 = arith.constant 1.000000e+00 : f32
    %232 = vector.broadcast %cst_96 : f32 to vector<8x32xf32>
    %233 = arith.addf %232, %231 : vector<8x32xf32>
    %234 = arith.divf %232, %233 : vector<8x32xf32>
    %235 = arith.addf %223, %227 : vector<8x32xf32>
    %236 = arith.negf %235 : vector<8x32xf32>
    %237 = math.exp %236 : vector<8x32xf32>
    %cst_97 = arith.constant 1.000000e+00 : f32
    %238 = vector.broadcast %cst_97 : f32 to vector<8x32xf32>
    %239 = arith.addf %238, %237 : vector<8x32xf32>
    %240 = arith.divf %238, %239 : vector<8x32xf32>
    %241 = arith.addf %228, %21 : vector<8x32xf32>
    %242 = arith.mulf %234, %241 : vector<8x32xf32>
    %243 = arith.addf %225, %242 : vector<8x32xf32>
    %244 = math.tanh %243 : vector<8x32xf32>
    %cst_98 = arith.constant 1.000000e+00 : f32
    %245 = vector.broadcast %cst_98 : f32 to vector<8x32xf32>
    %246 = arith.subf %245, %240 : vector<8x32xf32>
    %247 = arith.mulf %246, %244 : vector<8x32xf32>
    %248 = arith.mulf %240, %217 : vector<8x32xf32>
    %249 = arith.addf %247, %248 : vector<8x32xf32>
    %c7_i32 = arith.constant 7 : i32
    %c8_i32_99 = arith.constant 8 : i32
    %250 = arith.muli %c7_i32, %c8_i32_99 : i32
    %251 = tpu.assume_multiple %250, 8 : i32
    %252 = arith.index_cast %251 : i32 to index
    %c0_100 = arith.constant 0 : index
    %253 = vector.load %arg16[%252, %c0_100] : memref<64x32xf32, #tpu.memory_space<vmem>>, vector<8x32xf32>
    %254 = arith.index_cast %251 : i32 to index
    %c0_101 = arith.constant 0 : index
    %255 = vector.load %arg17[%254, %c0_101] : memref<64x32xf32, #tpu.memory_space<vmem>>, vector<8x32xf32>
    %256 = arith.index_cast %251 : i32 to index
    %c0_102 = arith.constant 0 : index
    %257 = vector.load %arg18[%256, %c0_102] : memref<64x32xf32, #tpu.memory_space<vmem>>, vector<8x32xf32>
    %cst_103 = arith.constant dense<0.000000e+00> : vector<8x32xf32>
    %258 = tpu.matmul %249, %22, %cst_103 {dimension_numbers = #tpu.dot_dimension_numbers<[1], [0], [0], [1], [0, 0, 1, 1], [], []>} : vector<8x32xf32>, vector<32x32xf32>, vector<8x32xf32> -> vector<8x32xf32>
    %cst_104 = arith.constant dense<0.000000e+00> : vector<8x32xf32>
    %259 = tpu.matmul %249, %23, %cst_104 {dimension_numbers = #tpu.dot_dimension_numbers<[1], [0], [0], [1], [0, 0, 1, 1], [], []>} : vector<8x32xf32>, vector<32x32xf32>, vector<8x32xf32> -> vector<8x32xf32>
    %cst_105 = arith.constant dense<0.000000e+00> : vector<8x32xf32>
    %260 = tpu.matmul %249, %24, %cst_105 {dimension_numbers = #tpu.dot_dimension_numbers<[1], [0], [0], [1], [0, 0, 1, 1], [], []>} : vector<8x32xf32>, vector<32x32xf32>, vector<8x32xf32> -> vector<8x32xf32>
    %261 = arith.addf %253, %258 : vector<8x32xf32>
    %262 = arith.negf %261 : vector<8x32xf32>
    %263 = math.exp %262 : vector<8x32xf32>
    %cst_106 = arith.constant 1.000000e+00 : f32
    %264 = vector.broadcast %cst_106 : f32 to vector<8x32xf32>
    %265 = arith.addf %264, %263 : vector<8x32xf32>
    %266 = arith.divf %264, %265 : vector<8x32xf32>
    %267 = arith.addf %255, %259 : vector<8x32xf32>
    %268 = arith.negf %267 : vector<8x32xf32>
    %269 = math.exp %268 : vector<8x32xf32>
    %cst_107 = arith.constant 1.000000e+00 : f32
    %270 = vector.broadcast %cst_107 : f32 to vector<8x32xf32>
    %271 = arith.addf %270, %269 : vector<8x32xf32>
    %272 = arith.divf %270, %271 : vector<8x32xf32>
    %273 = arith.addf %260, %21 : vector<8x32xf32>
    %274 = arith.mulf %266, %273 : vector<8x32xf32>
    %275 = arith.addf %257, %274 : vector<8x32xf32>
    %276 = math.tanh %275 : vector<8x32xf32>
    %cst_108 = arith.constant 1.000000e+00 : f32
    %277 = vector.broadcast %cst_108 : f32 to vector<8x32xf32>
    %278 = arith.subf %277, %272 : vector<8x32xf32>
    %279 = arith.mulf %278, %276 : vector<8x32xf32>
    %280 = arith.mulf %272, %249 : vector<8x32xf32>
    %281 = arith.addf %279, %280 : vector<8x32xf32>
    %c8_i32_109 = arith.constant 8 : i32
    %c0_110 = arith.constant 0 : index
    %c0_111 = arith.constant 0 : index
    %282 = vector.load %arg11[%c0_110, %c0_111] : memref<32x32xf32, #tpu.memory_space<vmem>>, vector<32x32xf32>
    %cst_112 = arith.constant dense<0.000000e+00> : vector<8x32xf32>
    %283 = tpu.matmul %281, %282, %cst_112 {dimension_numbers = #tpu.dot_dimension_numbers<[1], [0], [0], [1], [0, 0, 1, 1], [], []>} : vector<8x32xf32>, vector<32x32xf32>, vector<8x32xf32> -> vector<8x32xf32>
    %c0_113 = arith.constant 0 : index
    %c0_114 = arith.constant 0 : index
    %284 = vector.load %arg12[%c0_113, %c0_114] : memref<1x32xf32, #tpu.memory_space<vmem>>, vector<1x32xf32>
    %285 = vector.broadcast %284 : vector<1x32xf32> to vector<8x32xf32>
    %286 = arith.addf %283, %285 : vector<8x32xf32>
    %cst_115 = arith.constant 0.000000e+00 : f32
    %287 = vector.broadcast %cst_115 : f32 to vector<8x32xf32>
    %288 = arith.maximumf %286, %287 : vector<8x32xf32>
    %c0_116 = arith.constant 0 : index
    %c0_117 = arith.constant 0 : index
    %289 = vector.load %arg13[%c0_116, %c0_117] : memref<32x1xf32, #tpu.memory_space<vmem>>, vector<32x1xf32>
    %cst_118 = arith.constant dense<0.000000e+00> : vector<8x1xf32>
    %290 = tpu.matmul %288, %289, %cst_118 {dimension_numbers = #tpu.dot_dimension_numbers<[1], [0], [0], [1], [0, 0, 1, 1], [], []>} : vector<8x32xf32>, vector<32x1xf32>, vector<8x1xf32> -> vector<8x1xf32>
    %c0_119 = arith.constant 0 : index
    %c0_120 = arith.constant 0 : index
    %291 = vector.load %arg14[%c0_119, %c0_120] : memref<1x1xf32, #tpu.memory_space<vmem>>, vector<1x1xf32>
    %292 = vector.broadcast %291 : vector<1x1xf32> to vector<8x1xf32>
    %293 = arith.addf %290, %292 : vector<8x1xf32>
    %294 = arith.negf %293 : vector<8x1xf32>
    %295 = math.exp %294 : vector<8x1xf32>
    %cst_121 = arith.constant 1.000000e+00 : f32
    %296 = vector.broadcast %cst_121 : f32 to vector<8x1xf32>
    %297 = arith.addf %296, %295 : vector<8x1xf32>
    %298 = arith.divf %296, %297 : vector<8x1xf32>
    %c0_122 = arith.constant 0 : index
    %c0_123 = arith.constant 0 : index
    %299 = vector.load %arg15[%c0_122, %c0_123] : memref<8x1xf32, #tpu.memory_space<vmem>>, vector<8x1xf32>
    tpu.vector_store %arg15[%c0_122, %c0_123], %298 {strides = array<i32>} : memref<8x1xf32, #tpu.memory_space<vmem>>, vector<8x1xf32>,
    return
  }
}

</mosaic_0001>

<bundles_post_ra>
// kernel: tpu_custom_call.1
= control target key start
LH: loop header
LB: loop body
LE: loop exit
PB: predicated region body
PF: predicated region fallthrough
CT: control target
= control target key end

     0   :  { %s3973_s0 = inlined_call_operand.vmem [shape: f32[64,4], index: 0, kind: input, shape index: {}]   ;;  %s3974_s1 = inlined_call_operand.hbm [shape: f32[4,32], index: 1, kind: input, shape index: {}]   ;;  %s3975_s2 = inlined_call_operand.hbm [shape: f32[4,32], index: 2, kind: input, shape index: {}]   ;;  %s3976_s3 = inlined_call_operand.hbm [shape: f32[4,32], index: 3, kind: input, shape index: {}]   ;;  %s3977_s4 = inlined_call_operand.vmem [shape: f32[32,32], index: 4, kind: input, shape index: {}]   ;;  %s3978_s5 = inlined_call_operand.vmem [shape: f32[32,32], index: 5, kind: input, shape index: {}]   ;;  %s3979_s6 = inlined_call_operand.vmem [shape: f32[32,32], index: 6, kind: input, shape index: {}]   ;;  %s3980_s7 = inlined_call_operand.vmem [shape: f32[1,32], index: 7, kind: input, shape index: {}]   ;;  %s3981_s8 = inlined_call_operand.vmem [shape: f32[1,32], index: 8, kind: input, shape index: {}]   ;;  %s3982_s9 = inlined_call_operand.vmem [shape: f32[1,32], index: 9, kind: input, shape index: {}]   ;;  %s3983_s10 = inlined_call_operand.vmem [shape: f32[1,32], index: 10, kind: input, shape index: {}]   ;;  %s3984_s11 = inlined_call_operand.vmem [shape: f32[32,32], index: 11, kind: input, shape index: {}]   ;;  %s3985_s12 = inlined_call_operand.vmem [shape: f32[1,32], index: 12, kind: input, shape index: {}]   ;;  %s3986_s13 = inlined_call_operand.vmem [shape: f32[32,1], index: 13, kind: input, shape index: {}]   ;;  %s3987_s14 = inlined_call_operand.<no memory space> [shape: f32[1,1], index: 14, kind: input, shape index: {}]   ;;  %s3988_s15 = inlined_call_operand.vmem [shape: f32[8,1], index: 15, kind: output, shape index: {}]  }
   0x1   :  { %v20_v0 = vstv %s3987_s14 }
   0x2   :  { %21 = vst [vmem:[#allocation5] sm:$0x1] %v20_v0 }
   0x3   :  { %22 = vsyncpa [#allocation7], 0 }
   0x4   :  { %23 = vsyncpa [#allocation9], 0  ;;  %s3487_s20 = smov [#allocation8]   ;;  %s3488_s22 = smov [#allocation6]  }
   0x5   :  { %s42_s21 = sshll.u32 %s3487_s20, 4  ;;  %s32_s23 = sshll.u32 %s3488_s22, 4  ;;  %s43_s21 = int_to_ptr.vmem [resolvable:$true] %s42_s21  ;;  %s33_s23 = int_to_ptr.vmem [resolvable:$true] %s32_s23 }
   0x6   :  { %s3417_s26 = scalar_lea.hbm %s3975_s2, 64 }
   0x7   :  { %p3418_p0 = scmp.ne.s32.totalorder %s3975_s2, %s3417_s26  ;;  %p3421_p1 = scmp.lt.u32.totalorder %s3417_s26, %s3975_s2 }
   0x9   :  { %p3423_p2 = pnand %p3421_p1, %p3418_p0 }
   0xb   :  { %3426 = shalt.err (!%p3423_p2)
}
   0xc   :  { %s3427_s14 = scalar_lea.vmem %s43_s21, 64  ;;  %p3432_p4 = scmp.lt.s32.totalorder %s43_s21, %s43_s21 }
   0xd   :  { %p3428_p3 = scmp.ne.s32.totalorder %s43_s21, %s3427_s14  ;;  %p3433_p5 = scmp.lt.s32.totalorder %s3427_s14, %s3427_s14 }
   0xf   :  { %p3434_p6 = por %p3433_p5, %p3432_p4 }
  0x11   :  { %p3435_p7 = pnand %p3434_p6, %p3428_p3 }
  0x13   :  { %3438 = shalt.err (!%p3435_p7)
}
  0x14   :  { %45 = dma.hbm_to_vmem [thread:$0]  %s3975_s2, 64, %s43_s21, [#allocation9]  }
  0x15   :  { %s3439_s20 = scalar_lea.hbm %s3974_s1, 64 }
  0x16   :  { %p3440_p8 = scmp.ne.s32.totalorder %s3974_s1, %s3439_s20  ;;  %p3443_p9 = scmp.lt.u32.totalorder %s3439_s20, %s3974_s1 }
  0x18   :  { %p3445_p10 = pnand %p3443_p9, %p3440_p8 }
  0x1a   :  { %3448 = shalt.err (!%p3445_p10)
}
  0x1b   :  { %s3449_s27 = scalar_lea.vmem %s33_s23, 64  ;;  %p3454_p12 = scmp.lt.s32.totalorder %s33_s23, %s33_s23 }
  0x1c   :  { %p3450_p11 = scmp.ne.s32.totalorder %s33_s23, %s3449_s27  ;;  %p3455_p13 = scmp.lt.s32.totalorder %s3449_s27, %s3449_s27 }
  0x1e   :  { %p3456_p0 = por %p3455_p13, %p3454_p12 }
  0x20   :  { %p3457_p1 = pnand %p3456_p0, %p3450_p11 }
  0x22   :  { %3460 = shalt.err (!%p3457_p1)
}
  0x23   :  { %35 = dma.hbm_to_vmem [thread:$0]  %s3974_s1, 64, %s33_s23, [#allocation7]  }
  0x24   :  { %s3489_s28 = smov [#allocation10]   ;;  %s3461_s16 = scalar_lea.hbm %s3976_s3, 64 }
  0x25   :  { %s52_s29 = sshll.u32 %s3489_s28, 4  ;;  %p3462_p2 = scmp.ne.s32.totalorder %s3976_s3, %s3461_s16  ;;  %s53_s29 = int_to_ptr.vmem [resolvable:$true] %s52_s29 }
  0x26   :  { %p3465_p3 = scmp.lt.u32.totalorder %s3461_s16, %s3976_s3 }
  0x28   :  { %p3467_p4 = pnand %p3465_p3, %p3462_p2 }
  0x2a   :  { %3470 = shalt.err (!%p3467_p4)
}
  0x2b   :  { %s3471_s22 = scalar_lea.vmem %s53_s29, 64  ;;  %p3476_p6 = scmp.lt.s32.totalorder %s53_s29, %s53_s29 }
  0x2c   :  { %p3472_p5 = scmp.ne.s32.totalorder %s53_s29, %s3471_s22  ;;  %p3477_p7 = scmp.lt.s32.totalorder %s3471_s22, %s3471_s22 }
  0x2e   :  { %p3478_p8 = por %p3477_p7, %p3476_p6 }
  0x30   :  { %p3479_p9 = pnand %p3478_p8, %p3472_p5 }
  0x32   :  { %3482 = shalt.err (!%p3479_p9)
}
  0x33   :  { %55 = dma.hbm_to_vmem [thread:$0]  %s3976_s3, 64, %s53_s29, [#allocation9]  }
  0x34   :  { %3483 = dma.done.wait [#allocation7], 64  }
  0x35   :  { %3484 = vsyncadd [#allocation7], 4294967232 }
  0x36   :  { %3485 = dma.done.wait [#allocation9], 128  }
  0x37   :  { %3486 = vsyncadd [#allocation9], 4294967168  ;;  %vm128_vm0 = vcmask 1043456   ;;  %vm103_vm1 = vcmask 31744   ;;  %v246_v1 = vld [vmem:[#allocation8] sm:$0xf] }
  0x38   :  { %v87_v2 = vld [vmem:[%s3973_s0] sm:$0xff]  ;;  %v3618_v3 = vld [vmem:[%s3973_s0 + $0x8] sm:$0xff]  ;;  %2857 = vmatprep.subr.msk.mxu1 %vm128_vm0, %v246_v1  ;;  %v89_v8 = vld [vmem:[%s3973_s0 + $0x10] sm:$0xff]  ;;  %v3490_v9 = vmov 0.0|0.0   ;;  %vm3491_vm2 = vmmov 0   ;;  %v3492_v21 = vmov 0.0  }
  0x39   :  { %2859 = vmatprep.mubr.msk.f32.mxu1 %vm103_vm1, %v87_v2  ;;  %v501_v4 = vld [vmem:[%s3977_s4] sm:$0xff]  ;;  %v502_v5 = vld [vmem:[%s3977_s4 + $0x8] sm:$0xff]  ;;  %2858 = vmatpush3.msk.msra.mxu1 %vm128_vm0, %v246_v1  ;;  %v503_v10 = vld [vmem:[%s3977_s4 + $0x10] sm:$0xff]  ;;  %vm237_vm3 = vcmask 261120   ;;  %vm2605_vm4 = vcmask 7168  }
  0x3a   :  { %v95_v6 = vld [vmem:[#allocation6] sm:$0xf]  ;;  %v3629_v7 = vpack.c.bf16 %v502_v5, %v501_v4  ;;  %2860 = vmatmul.mubr.msk.f32.vlgmr.msra.gmra.mrb[0].mxu1 %vm103_vm1, %v3618_v3  ;;  %3171 = vmatprep.subr.bf16.mxu1 %v3490_v9  ;;  %v504_v11 = vld [vmem:[%s3977_s4 + $0x18] sm:$0xff]  ;;  %v370_v14 = vld [vmem:[#allocation10] sm:$0xf] }
  0x3b   :  { %2843 = vmatprep.subr.msk.mxu0 %vm128_vm0, %v95_v6  ;;  %2862 = vmatprep.mubr.msk.f32.mxu1 %vm103_vm1, %v89_v8  ;;  %v90_v12 = vld [vmem:[%s3973_s0 + $0x18] sm:$0xff]  ;;  %v3649_v13 = vpack.c.bf16 %v504_v11, %v503_v10  ;;  %v91_v15 = vld [vmem:[%s3973_s0 + $0x20] sm:$0xff]  ;;  %v92_v16 = vld [vmem:[%s3973_s0 + $0x28] sm:$0xff] }
  0x3c   :  { %3173 = vmatpush3.bf16.msra.mxu1 %v3629_v7  ;;  %2844 = vmatpush3.msk.msra.mxu0 %vm128_vm0, %v95_v6  ;;  %v93_v17 = vld [vmem:[%s3973_s0 + $0x30] sm:$0xff]  ;;  %v94_v18 = vld [vmem:[%s3973_s0 + $0x38] sm:$0xff]  ;;  %v505_v19 = vld [vmem:[%s3978_s5] sm:$0xff] }
  0x3d   :  { %2845 = vmatprep.mubr.msk.f32.mxu0 %vm103_vm1, %v87_v2  ;;  %3174 = vmatprep.subr.bf16.mxu1 %v3490_v9  ;;  %v506_v20 = vld [vmem:[%s3978_s5 + $0x8] sm:$0xff]  ;;  %v509_v23 = vld [vmem:[%s3979_s6] sm:$0xff]  ;;  %v507_v25 = vld [vmem:[%s3978_s5 + $0x10] sm:$0xff] }
  0x3e   :  { %2846 = vmatmul.mubr.msk.f32.vlgmr.msra.gmra.mrb[0].mxu0 %vm103_vm1, %v3618_v3  ;;  %2863 = vmatmul.mubr.msk.f32.gmra.mrb[2].mxu1 %vm103_vm1, %v90_v12  ;;  %v3691_v22 = vpack.c.bf16 %v506_v20, %v505_v19  ;;  %v510_v24 = vld [vmem:[%s3979_s6 + $0x8] sm:$0xff]  ;;  %v508_v26 = vld [vmem:[%s3978_s5 + $0x18] sm:$0xff]  ;;  %v511_v29 = vld [vmem:[%s3979_s6 + $0x10] sm:$0xff] }
  0x3f   :  { %2871 = vmatprep.subr.msk.mxu0 %vm128_vm0, %v370_v14  ;;  %2865 = vmatprep.mubr.msk.f32.mxu1 %vm103_vm1, %v91_v15  ;;  %v3708_v27 = vpack.c.bf16 %v510_v24, %v509_v23  ;;  %v3711_v28 = vpack.c.bf16 %v508_v26, %v507_v25  ;;  %v512_v30 = vld [vmem:[%s3979_s6 + $0x18] sm:$0xff]  ;;  %v2623_v32 = vld [vmem:[%s3981_s8] ss:$0 sm:$0xff] }
  0x40   :  { %3176 = vmatpush3.bf16.msra.mxu1 %v3649_v13  ;;  %2872 = vmatpush3.msk.msra.mxu0 %vm128_vm0, %v370_v14  ;;  %v3728_v31 = vpack.c.bf16 %v512_v30, %v511_v29  ;;  %v2613_v36 = vld [vmem:[%s3980_s7] ss:$0 sm:$0xff] }
  0x41   :  { %2848 = vmatprep.mubr.msk.f32.mxu0 %vm103_vm1, %v89_v8  ;;  %3177 = vmatprep.subr.bf16.mxu1 %v3490_v9  ;;  %v2633_v6 = vld [vmem:[%s3982_s9] ss:$0 sm:$0xff] }
  0x42   :  { %2849 = vmatmul.mubr.msk.f32.gmra.mrb[2].mxu0 %vm103_vm1, %v90_v12  ;;  %2866 = vmatmul.mubr.msk.f32.gmra.mrb[4].mxu1 %vm103_vm1, %v92_v16 }
  0x43   :  { %2851 = vmatprep.mubr.msk.f32.mxu0 %vm103_vm1, %v91_v15  ;;  %2868 = vmatprep.mubr.msk.f32.mxu1 %vm103_vm1, %v93_v17 }
  0x44   :  { %3183 = vmatprep.subr.bf16.mxu0 %v3490_v9 }
  0x46   :  { %2852 = vmatmul.mubr.msk.f32.gmra.mrb[4].mxu0 %vm103_vm1, %v92_v16  ;;  %2869 = vmatmul.mubr.msk.f32.gmra.mrb[6].mxu1 %vm103_vm1, %v94_v18 }
  0x47   :  { %2854 = vmatprep.mubr.msk.f32.mxu0 %vm103_vm1, %v93_v17  ;;  %2893 = vmatprep.mubr.msk.f32.mxu1 %vm3491_vm2, %v3492_v21 }
  0x4a   :  { %2855 = vmatmul.mubr.msk.f32.gmra.mrb[6].mxu0 %vm103_vm1, %v94_v18  ;;  %2894 = vmatmul.mubr.f32.vlgmr.msra.gmra.mrb[8].mxu1 %v3492_v21 }
  0x4b   :  { %2873 = vmatprep.mubr.msk.f32.mxu0 %vm103_vm1, %v87_v2  ;;  %3179 = vmatpush3.bf16.msra.mxu1 %v3691_v22 }
  0x4c   :  { %2904 = vmatprep.mubr.msk.f32.mxu1 %vm3491_vm2, %v3492_v21  ;;  %3180 = vmatprep.subr.bf16.mxu1 %v3490_v9 }
  0x4e   :  { %2874 = vmatmul.mubr.msk.f32.vlgmr.msra.gmra.mrb[8].mxu0 %vm103_vm1, %v3618_v3 }
  0x4f   :  { %3185 = vmatpush3.bf16.msra.mxu0 %v3708_v27  ;;  %2876 = vmatprep.mubr.msk.f32.mxu0 %vm103_vm1, %v89_v8 }
  0x50   :  { %3182 = vmatpush3.bf16.msra.mxu1 %v3711_v28  ;;  %3186 = vmatprep.subr.bf16.mxu0 %v3490_v9 }
  0x51   :  { %3189 = vmatprep.subr.bf16.mxu1 %v3490_v9 }
  0x52   :  { %2877 = vmatmul.mubr.msk.f32.gmra.mrb[10].mxu0 %vm103_vm1, %v90_v12 }
  0x53   :  { %2905 = vmatmul.mubr.f32.vlgmr.msra.gmra.mrb[10].mxu1 %v3492_v21  ;;  %2879 = vmatprep.mubr.msk.f32.mxu0 %vm103_vm1, %v91_v15 }
  0x54   :  { %3188 = vmatpush3.bf16.msra.mxu0 %v3728_v31  ;;  %3191 = vmatpush3.bf16.msra.mxu1 %v3629_v7 }
  0x55   :  { %3195 = vmatprep.subr.bf16.mxu0 %v3490_v9  ;;  %3192 = vmatprep.subr.bf16.mxu1 %v3490_v9 }
  0x56   :  { %2880 = vmatmul.mubr.msk.f32.gmra.mrb[12].mxu0 %vm103_vm1, %v92_v16  ;;  %2926 = vmatprep.mubr.msk.f32.mxu1 %vm3491_vm2, %v3492_v21 }
  0x57   :  { %2882 = vmatprep.mubr.msk.f32.mxu0 %vm103_vm1, %v93_v17 }
  0x58   :  { %3194 = vmatpush3.bf16.msra.mxu1 %v3649_v13 }
  0x59   :  { %3201 = vmatprep.subr.bf16.mxu1 %v3490_v9 }
  0x5a   :  { %2883 = vmatmul.mubr.msk.f32.gmra.mrb[14].mxu0 %vm103_vm1, %v94_v18 }
  0x5b   :  { %2915 = vmatprep.mubr.msk.f32.mxu0 %vm3491_vm2, %v3492_v21 }
  0x5e   :  { %2916 = vmatmul.mubr.f32.vlgmr.msra.gmra.mrb[16].mxu0 %v3492_v21 }
  0x5f   :  { %3197 = vmatpush3.bf16.msra.mxu0 %v3691_v22  ;;  %2937 = vmatprep.mubr.msk.f32.mxu0 %vm3491_vm2, %v3492_v21 }
  0x60   :  { %3198 = vmatprep.subr.bf16.mxu0 %v3490_v9 }
  0x63   :  { %3200 = vmatpush3.bf16.msra.mxu0 %v3711_v28 }
  0x64   :  { %3207 = vmatprep.subr.bf16.mxu0 %v3490_v9 }
 0x10d   :  { %v2861_v33 = vpop.f32.mrb[0].mxu1 }
 0x10e   :  { %v329_v34 = vadd.f32 %v2861_v33, %v2623_v32  ;;  %v323_v35 = vpop.f32.mrb[1].mxu1 }
 0x10f   :  { %v324_v37 = vadd.f32 %v2623_v32, %v323_v35 }
 0x110   :  { %363 = vst.msk [vmem:[#allocation3 + $0x8] sm:$0xff] %vm237_vm3, %v329_v34 }
 0x111   :  { %v2847_v38 = vpop.f32.mrb[0].mxu0  ;;  %362 = vst.msk [vmem:[#allocation3] sm:$0xff] %vm237_vm3, %v324_v37  ;;  %v2864_v39 = vpop.f32.mrb[2].mxu1 }
 0x112   :  { %v204_v40 = vadd.f32 %v2847_v38, %v2613_v36  ;;  %v198_v41 = vpop.f32.mrb[1].mxu0  ;;  %v339_v42 = vadd.f32 %v2864_v39, %v2623_v32  ;;  %v333_v43 = vpop.f32.mrb[3].mxu1 }
 0x113   :  { %v199_v44 = vadd.f32 %v2613_v36, %v198_v41  ;;  %v334_v45 = vadd.f32 %v2623_v32, %v333_v43  ;;  %v3790_v41 = vld [vmem:[%s3983_s10] ss:$0 sm:$0xff] }
 0x114   :  { %239 = vst.msk [vmem:[#allocation2 + $0x8] sm:$0xff] %vm237_vm3, %v204_v40  ;;  %365 = vst.msk [vmem:[#allocation3 + $0x18] sm:$0xff] %vm237_vm3, %v339_v42 }
 0x115   :  { %238 = vst.msk [vmem:[#allocation2] sm:$0xff] %vm237_vm3, %v199_v44  ;;  %v2850_v46 = vpop.f32.mrb[2].mxu0  ;;  %364 = vst.msk [vmem:[#allocation3 + $0x10] sm:$0xff] %vm237_vm3, %v334_v45  ;;  %v2867_v47 = vpop.f32.mrb[4].mxu1 }
 0x116   :  { %v214_v48 = vadd.f32 %v2850_v46, %v2613_v36  ;;  %v208_v49 = vpop.f32.mrb[3].mxu0  ;;  %v349_v50 = vadd.f32 %v2867_v47, %v2623_v32  ;;  %v343_v51 = vpop.f32.mrb[5].mxu1 }
 0x117   :  { %v209_v52 = vadd.f32 %v2613_v36, %v208_v49  ;;  %v344_v53 = vadd.f32 %v2623_v32, %v343_v51 }
 0x118   :  { %241 = vst.msk [vmem:[#allocation2 + $0x18] sm:$0xff] %vm237_vm3, %v214_v48  ;;  %367 = vst.msk [vmem:[#allocation3 + $0x28] sm:$0xff] %vm237_vm3, %v349_v50  ;;  %v514_v16 = vld [vmem:[#allocation3] sm:$0xff] }
 0x119   :  { %240 = vst.msk [vmem:[#allocation2 + $0x10] sm:$0xff] %vm237_vm3, %v209_v52  ;;  %v2853_v54 = vpop.f32.mrb[4].mxu0  ;;  %366 = vst.msk [vmem:[#allocation3 + $0x20] sm:$0xff] %vm237_vm3, %v344_v53  ;;  %v2870_v55 = vpop.f32.mrb[6].mxu1 }
 0x11a   :  { %v224_v56 = vadd.f32 %v2853_v54, %v2613_v36  ;;  %v218_v57 = vpop.f32.mrb[5].mxu0  ;;  %v359_v58 = vadd.f32 %v2870_v55, %v2623_v32  ;;  %v353_v59 = vpop.f32.mrb[7].mxu1 }
 0x11b   :  { %v219_v60 = vadd.f32 %v2613_v36, %v218_v57  ;;  %v354_v61 = vadd.f32 %v2623_v32, %v353_v59  ;;  %v751_v55 = vld [vmem:[#allocation2 + $0x8] sm:$0xff] }
 0x11c   :  { %v513_v62 = vld [vmem:[#allocation2] sm:$0xff]  ;;  %243 = vst.msk [vmem:[#allocation2 + $0x28] sm:$0xff] %vm237_vm3, %v224_v56  ;;  %369 = vst.msk [vmem:[#allocation3 + $0x38] sm:$0xff] %vm237_vm3, %v359_v58 }
 0x11d   :  { %242 = vst.msk [vmem:[#allocation2 + $0x20] sm:$0xff] %vm237_vm3, %v219_v60  ;;  %v2856_v63 = vpop.f32.mrb[6].mxu0  ;;  %368 = vst.msk [vmem:[#allocation3 + $0x30] sm:$0xff] %vm237_vm3, %v354_v61  ;;  %v585_v0 = vpop.f32.mrb[8].mxu1 }
 0x11e   :  { %v234_v1 = vadd.f32 %v2856_v63, %v2613_v36  ;;  %v228_v2 = vpop.f32.mrb[7].mxu0  ;;  %v659_v3 = vadd.f32 %v585_v0, %v513_v62  ;;  %v2895_v4 = vpop.f32.mrb[9].mxu1  ;;  %v753_v62 = vld [vmem:[#allocation3 + $0x8] sm:$0xff] }
 0x11f   :  { %v229_v5 = vadd.f32 %v2613_v36, %v228_v2 }
 0x120   :  { %245 = vst.msk [vmem:[#allocation2 + $0x38] sm:$0xff] %vm237_vm3, %v234_v1  ;;  %v2644_v8 = vmul.f32 -1.442695, %v659_v3 }
 0x121   :  { %244 = vst.msk [vmem:[#allocation2 + $0x30] sm:$0xff] %vm237_vm3, %v229_v5  ;;  %v2875_v10 = vpop.f32.mrb[8].mxu0 }
 0x122   :  { %v453_v11 = vadd.f32 %v2875_v10, %v2633_v6  ;;  %v447_v12 = vpop.f32.mrb[9].mxu0  ;;  %3333 = vpow2.f32 %v2644_v8 }
 0x123   :  { %v448_v14 = vadd.f32 %v2633_v6, %v447_v12 }
 0x124   :  { %487 = vst.msk [vmem:[#allocation4 + $0x8] sm:$0xff] %vm237_vm3, %v453_v11 }
 0x125   :  { %486 = vst.msk [vmem:[#allocation4] sm:$0xff] %vm237_vm3, %v448_v14  ;;  %v2878_v15 = vpop.f32.mrb[10].mxu0 }
 0x126   :  { %v655_v17 = vpop.f32.mrb[10].mxu1  ;;  %v463_v18 = vadd.f32 %v2878_v15, %v2633_v6  ;;  %v457_v19 = vpop.f32.mrb[11].mxu0 }
 0x127   :  { %v666_v20 = vadd.f32 %v655_v17, %v514_v16  ;;  %v2906_v23 = vpop.f32.mrb[11].mxu1  ;;  %v458_v24 = vadd.f32 %v2633_v6, %v457_v19 }
 0x128   :  { %489 = vst.msk [vmem:[#allocation4 + $0x18] sm:$0xff] %vm237_vm3, %v463_v18  ;;  %v991_v23 = vld [vmem:[#allocation2 + $0x10] sm:$0xff] }
 0x129   :  { %v2645_v25 = vmul.f32 -1.442695, %v666_v20  ;;  %488 = vst.msk [vmem:[#allocation4 + $0x10] sm:$0xff] %vm237_vm3, %v458_v24  ;;  %v2881_v26 = vpop.f32.mrb[12].mxu0 }
 0x12a   :  { %v473_v29 = vadd.f32 %v2881_v26, %v2633_v6  ;;  %v467_v30 = vpop.f32.mrb[13].mxu0 }
 0x12b   :  { %3335 = vpow2.f32 %v2645_v25  ;;  %v468_v32 = vadd.f32 %v2633_v6, %v467_v30  ;;  %v755_v12 = vld [vmem:[#allocation4 + $0x8] sm:$0xff] }
 0x12c   :  { %491 = vst.msk [vmem:[#allocation4 + $0x28] sm:$0xff] %vm237_vm3, %v473_v29  ;;  %v3334_v33 = vpop.eup %3333  ;;  %v515_v47 = vld [vmem:[#allocation4] sm:$0xff] }
 0x12d   :  { %490 = vst.msk [vmem:[#allocation4 + $0x20] sm:$0xff] %vm237_vm3, %v468_v32  ;;  %v2884_v34 = vpop.f32.mrb[14].mxu0  ;;  %v663_v35 = vadd.f32 1.0, %v3334_v33  ;;  %v993_v33 = vld [vmem:[#allocation3 + $0x10] sm:$0xff] }
 0x12e   :  { %v483_v36 = vadd.f32 %v2884_v34, %v2633_v6  ;;  %v477_v37 = vpop.f32.mrb[15].mxu0 }
 0x12f   :  { %v478_v38 = vadd.f32 %v2633_v6, %v477_v37  ;;  %3337 = vrcp.f32 %v663_v35 }
 0x130   :  { %493 = vst.msk [vmem:[#allocation4 + $0x38] sm:$0xff] %vm237_vm3, %v483_v36 }
 0x131   :  { %492 = vst.msk [vmem:[#allocation4 + $0x30] sm:$0xff] %vm237_vm3, %v478_v38  ;;  %v739_v39 = vpop.f32.mrb[16].mxu0 }
 0x132   :  { %v2917_v40 = vpop.f32.mrb[17].mxu0  ;;  %v740_v44 = vadd.f32 %v3790_v41, %v739_v39 }
 0x135   :  { %v3336_v42 = vpop.eup %3335 }
 0x136   :  { %v670_v43 = vadd.f32 1.0, %v3336_v42 }
 0x138   :  { %3339 = vrcp.f32 %v670_v43 }
 0x139   :  { %v3338_v45 = vpop.eup %3337 }
 0x13a   :  { %v743_v46 = vmul.f32 %v3338_v45, %v740_v44 }
 0x13c   :  { %v744_v48 = vadd.f32 %v743_v46, %v515_v47  ;;  %v995_v46 = vld [vmem:[#allocation4 + $0x10] sm:$0xff] }
 0x13e   :  { %3341 = vtanh.f32 %v744_v48 }
 0x142   :  { %v3340_v49 = vpop.eup %3339 }
 0x143   :  { %v746_v50 = vsub.f32 1.0, %v3340_v49  ;;  %v748_v53 = vmul.f32 0.0, %v3340_v49 }
 0x148   :  { %v3342_v51 = vpop.eup %3341 }
 0x149   :  { %v747_v52 = vmul.f32 %v3342_v51, %v746_v50 }
 0x14b   :  { %v749_v54 = vadd.f32 %v748_v53, %v747_v52 }
 0x14d   :  { %2927 = vmatmul.mubr.msk.f32.vlgmr.msra.gmra.mrb[12].mxu1 %vm237_vm3, %v749_v54  ;;  %2938 = vmatmul.mubr.msk.f32.vlgmr.msra.gmra.mrb[18].mxu0 %vm237_vm3, %v749_v54 }
 0x14e   :  { %3203 = vmatpush3.bf16.msra.mxu1 %v3708_v27  ;;  %2948 = vmatprep.mubr.msk.f32.mxu1 %vm3491_vm2, %v3492_v21 }
 0x14f   :  { %3204 = vmatprep.subr.bf16.mxu1 %v3490_v9  ;;  %3209 = vmatpush3.bf16.msra.mxu0 %v3629_v7 }
 0x150   :  { %3210 = vmatprep.subr.bf16.mxu0 %v3490_v9  ;;  %2959 = vmatprep.mubr.msk.f32.mxu0 %vm3491_vm2, %v3492_v21 }
 0x152   :  { %3206 = vmatpush3.bf16.msra.mxu1 %v3728_v31 }
 0x153   :  { %3213 = vmatprep.subr.bf16.mxu1 %v3490_v9  ;;  %3212 = vmatpush3.bf16.msra.mxu0 %v3649_v13 }
 0x154   :  { %3219 = vmatprep.subr.bf16.mxu0 %v3490_v9 }
 0x155   :  { %2949 = vmatmul.mubr.msk.f32.vlgmr.msra.gmra.mrb[14].mxu1 %vm237_vm3, %v749_v54 }
 0x156   :  { %3215 = vmatpush3.bf16.msra.mxu1 %v3691_v22  ;;  %2970 = vmatprep.mubr.msk.f32.mxu1 %vm3491_vm2, %v3492_v21 }
 0x157   :  { %3216 = vmatprep.subr.bf16.mxu1 %v3490_v9 }
 0x15a   :  { %3218 = vmatpush3.bf16.msra.mxu1 %v3711_v28 }
 0x15b   :  { %3225 = vmatprep.subr.bf16.mxu1 %v3490_v9 }
 0x220   :  { %v825_v56 = vpop.f32.mrb[12].mxu1  ;;  %v895_v57 = vpop.f32.mrb[18].mxu0 }
 0x221   :  { %v899_v58 = vadd.f32 %v825_v56, %v751_v55  ;;  %v2928_v59 = vpop.f32.mrb[13].mxu1  ;;  %v2939_v60 = vpop.f32.mrb[19].mxu0  ;;  %v906_v63 = vadd.f32 %v895_v57, %v753_v62 }
 0x223   :  { %v2648_v61 = vmul.f32 -1.442695, %v899_v58  ;;  %v2649_v0 = vmul.f32 -1.442695, %v906_v63 }
 0x225   :  { %3343 = vpow2.f32 %v2648_v61  ;;  %v1233_v61 = vld [vmem:[#allocation3 + $0x18] sm:$0xff] }
 0x226   :  { %3345 = vpow2.f32 %v2649_v0 }
 0x228   :  { %v979_v1 = vpop.f32.mrb[14].mxu1 }
 0x229   :  { %v2950_v2 = vpop.f32.mrb[15].mxu1  ;;  %v980_v8 = vadd.f32 %v3790_v41, %v979_v1 }
 0x22f   :  { %v3344_v3 = vpop.eup %3343 }
 0x230   :  { %v903_v4 = vadd.f32 1.0, %v3344_v3  ;;  %v3346_v5 = vpop.eup %3345 }
 0x231   :  { %v910_v6 = vadd.f32 1.0, %v3346_v5 }
 0x232   :  { %3347 = vrcp.f32 %v903_v4 }
 0x233   :  { %3349 = vrcp.f32 %v910_v6 }
 0x23c   :  { %v3348_v10 = vpop.eup %3347 }
 0x23d   :  { %v983_v11 = vmul.f32 %v3348_v10, %v980_v8  ;;  %v3350_v15 = vpop.eup %3349 }
 0x23e   :  { %v986_v16 = vsub.f32 1.0, %v3350_v15  ;;  %v988_v19 = vmul.f32 %v3350_v15, %v749_v54  ;;  %v1231_v54 = vld [vmem:[#allocation2 + $0x18] sm:$0xff] }
 0x23f   :  { %v984_v14 = vadd.f32 %v983_v11, %v755_v12  ;;  %v1235_v11 = vld [vmem:[#allocation4 + $0x18] sm:$0xff] }
 0x241   :  { %3351 = vtanh.f32 %v984_v14 }
 0x24b   :  { %v3352_v17 = vpop.eup %3351 }
 0x24c   :  { %v987_v18 = vmul.f32 %v3352_v17, %v986_v16 }
 0x24e   :  { %v989_v20 = vadd.f32 %v988_v19, %v987_v18 }
 0x250   :  { %2960 = vmatmul.mubr.msk.f32.vlgmr.msra.gmra.mrb[20].mxu0 %vm237_vm3, %v989_v20  ;;  %2971 = vmatmul.mubr.msk.f32.vlgmr.msra.gmra.mrb[16].mxu1 %vm237_vm3, %v989_v20 }
 0x251   :  { %3221 = vmatpush3.bf16.msra.mxu0 %v3708_v27  ;;  %2981 = vmatprep.mubr.msk.f32.mxu0 %vm3491_vm2, %v3492_v21 }
 0x252   :  { %3222 = vmatprep.subr.bf16.mxu0 %v3490_v9  ;;  %3227 = vmatpush3.bf16.msra.mxu1 %v3629_v7 }
 0x253   :  { %3228 = vmatprep.subr.bf16.mxu1 %v3490_v9  ;;  %2992 = vmatprep.mubr.msk.f32.mxu1 %vm3491_vm2, %v3492_v21 }
 0x255   :  { %3224 = vmatpush3.bf16.msra.mxu0 %v3728_v31 }
 0x256   :  { %3231 = vmatprep.subr.bf16.mxu0 %v3490_v9  ;;  %3230 = vmatpush3.bf16.msra.mxu1 %v3649_v13 }
 0x257   :  { %3237 = vmatprep.subr.bf16.mxu1 %v3490_v9 }
 0x258   :  { %2982 = vmatmul.mubr.msk.f32.vlgmr.msra.gmra.mrb[22].mxu0 %vm237_vm3, %v989_v20 }
 0x259   :  { %3233 = vmatpush3.bf16.msra.mxu0 %v3691_v22  ;;  %3003 = vmatprep.mubr.msk.f32.mxu0 %vm3491_vm2, %v3492_v21 }
 0x25a   :  { %3234 = vmatprep.subr.bf16.mxu0 %v3490_v9 }
 0x25d   :  { %3236 = vmatpush3.bf16.msra.mxu0 %v3711_v28 }
 0x25e   :  { %3243 = vmatprep.subr.bf16.mxu0 %v3490_v9 }
 0x323   :  { %v1065_v24 = vpop.f32.mrb[20].mxu0  ;;  %v1135_v25 = vpop.f32.mrb[16].mxu1 }
 0x324   :  { %v1139_v26 = vadd.f32 %v1065_v24, %v991_v23  ;;  %v2961_v29 = vpop.f32.mrb[21].mxu0  ;;  %v2972_v30 = vpop.f32.mrb[17].mxu1  ;;  %v1146_v34 = vadd.f32 %v1135_v25, %v993_v33 }
 0x326   :  { %v2653_v32 = vmul.f32 -1.442695, %v1139_v26  ;;  %v2654_v35 = vmul.f32 -1.442695, %v1146_v34 }
 0x328   :  { %3353 = vpow2.f32 %v2653_v32  ;;  %v1473_v32 = vld [vmem:[#allocation3 + $0x20] sm:$0xff] }
 0x329   :  { %3355 = vpow2.f32 %v2654_v35 }
 0x32b   :  { %v1219_v36 = vpop.f32.mrb[22].mxu0 }
 0x32c   :  { %v2983_v37 = vpop.f32.mrb[23].mxu0  ;;  %v1220_v43 = vadd.f32 %v3790_v41, %v1219_v36 }
 0x332   :  { %v3354_v38 = vpop.eup %3353 }
 0x333   :  { %v1143_v39 = vadd.f32 1.0, %v3354_v38  ;;  %v3356_v40 = vpop.eup %3355 }
 0x334   :  { %v1150_v42 = vadd.f32 1.0, %v3356_v40 }
 0x335   :  { %3357 = vrcp.f32 %v1143_v39 }
 0x336   :  { %3359 = vrcp.f32 %v1150_v42 }
 0x33f   :  { %v3358_v44 = vpop.eup %3357 }
 0x340   :  { %v1223_v45 = vmul.f32 %v3358_v44, %v1220_v43  ;;  %v3360_v48 = vpop.eup %3359 }
 0x341   :  { %v1226_v49 = vsub.f32 1.0, %v3360_v48  ;;  %v1228_v52 = vmul.f32 %v3360_v48, %v989_v20  ;;  %v1471_v20 = vld [vmem:[#allocation2 + $0x20] sm:$0xff] }
 0x342   :  { %v1224_v47 = vadd.f32 %v1223_v45, %v995_v46  ;;  %v1475_v45 = vld [vmem:[#allocation4 + $0x20] sm:$0xff] }
 0x344   :  { %3361 = vtanh.f32 %v1224_v47 }
 0x34e   :  { %v3362_v50 = vpop.eup %3361 }
 0x34f   :  { %v1227_v51 = vmul.f32 %v3362_v50, %v1226_v49 }
 0x351   :  { %v1229_v53 = vadd.f32 %v1228_v52, %v1227_v51 }
 0x353   :  { %2993 = vmatmul.mubr.msk.f32.vlgmr.msra.gmra.mrb[18].mxu1 %vm237_vm3, %v1229_v53  ;;  %3004 = vmatmul.mubr.msk.f32.vlgmr.msra.gmra.mrb[24].mxu0 %vm237_vm3, %v1229_v53 }
 0x354   :  { %3239 = vmatpush3.bf16.msra.mxu1 %v3708_v27  ;;  %3014 = vmatprep.mubr.msk.f32.mxu1 %vm3491_vm2, %v3492_v21 }
 0x355   :  { %3240 = vmatprep.subr.bf16.mxu1 %v3490_v9  ;;  %3245 = vmatpush3.bf16.msra.mxu0 %v3629_v7 }
 0x356   :  { %3246 = vmatprep.subr.bf16.mxu0 %v3490_v9  ;;  %3025 = vmatprep.mubr.msk.f32.mxu0 %vm3491_vm2, %v3492_v21 }
 0x358   :  { %3242 = vmatpush3.bf16.msra.mxu1 %v3728_v31 }
 0x359   :  { %3249 = vmatprep.subr.bf16.mxu1 %v3490_v9  ;;  %3248 = vmatpush3.bf16.msra.mxu0 %v3649_v13 }
 0x35a   :  { %3255 = vmatprep.subr.bf16.mxu0 %v3490_v9 }
 0x35b   :  { %3015 = vmatmul.mubr.msk.f32.vlgmr.msra.gmra.mrb[20].mxu1 %vm237_vm3, %v1229_v53 }
 0x35c   :  { %3251 = vmatpush3.bf16.msra.mxu1 %v3691_v22  ;;  %3036 = vmatprep.mubr.msk.f32.mxu1 %vm3491_vm2, %v3492_v21 }
 0x35d   :  { %3252 = vmatprep.subr.bf16.mxu1 %v3490_v9 }
 0x360   :  { %3254 = vmatpush3.bf16.msra.mxu1 %v3711_v28 }
 0x361   :  { %3261 = vmatprep.subr.bf16.mxu1 %v3490_v9 }
 0x426   :  { %v1305_v55 = vpop.f32.mrb[18].mxu1  ;;  %v1375_v56 = vpop.f32.mrb[24].mxu0 }
 0x427   :  { %v1379_v57 = vadd.f32 %v1305_v55, %v1231_v54  ;;  %v2994_v58 = vpop.f32.mrb[19].mxu1  ;;  %v3005_v59 = vpop.f32.mrb[25].mxu0  ;;  %v1386_v62 = vadd.f32 %v1375_v56, %v1233_v61 }
 0x429   :  { %v2658_v60 = vmul.f32 -1.442695, %v1379_v57  ;;  %v2659_v63 = vmul.f32 -1.442695, %v1386_v62 }
 0x42b   :  { %3363 = vpow2.f32 %v2658_v60  ;;  %v1713_v60 = vld [vmem:[#allocation3 + $0x28] sm:$0xff] }
 0x42c   :  { %3365 = vpow2.f32 %v2659_v63 }
 0x42e   :  { %v1459_v0 = vpop.f32.mrb[20].mxu1 }
 0x42f   :  { %v3016_v1 = vpop.f32.mrb[21].mxu1  ;;  %v1460_v6 = vadd.f32 %v3790_v41, %v1459_v0 }
 0x435   :  { %v3364_v2 = vpop.eup %3363 }
 0x436   :  { %v1383_v3 = vadd.f32 1.0, %v3364_v2  ;;  %v3366_v4 = vpop.eup %3365 }
 0x437   :  { %v1390_v5 = vadd.f32 1.0, %v3366_v4 }
 0x438   :  { %3367 = vrcp.f32 %v1383_v3 }
 0x439   :  { %3369 = vrcp.f32 %v1390_v5 }
 0x442   :  { %v3368_v8 = vpop.eup %3367 }
 0x443   :  { %v1463_v10 = vmul.f32 %v3368_v8, %v1460_v6  ;;  %v3370_v14 = vpop.eup %3369 }
 0x444   :  { %v1466_v15 = vsub.f32 1.0, %v3370_v14  ;;  %v1468_v18 = vmul.f32 %v3370_v14, %v1229_v53  ;;  %v1711_v53 = vld [vmem:[#allocation2 + $0x28] sm:$0xff] }
 0x445   :  { %v1464_v12 = vadd.f32 %v1463_v10, %v1235_v11  ;;  %v1715_v10 = vld [vmem:[#allocation4 + $0x28] sm:$0xff] }
 0x447   :  { %3371 = vtanh.f32 %v1464_v12 }
 0x451   :  { %v3372_v16 = vpop.eup %3371 }
 0x452   :  { %v1467_v17 = vmul.f32 %v3372_v16, %v1466_v15 }
 0x454   :  { %v1469_v19 = vadd.f32 %v1468_v18, %v1467_v17 }
 0x456   :  { %3026 = vmatmul.mubr.msk.f32.vlgmr.msra.gmra.mrb[26].mxu0 %vm237_vm3, %v1469_v19  ;;  %3037 = vmatmul.mubr.msk.f32.vlgmr.msra.gmra.mrb[22].mxu1 %vm237_vm3, %v1469_v19 }
 0x457   :  { %3257 = vmatpush3.bf16.msra.mxu0 %v3708_v27  ;;  %3047 = vmatprep.mubr.msk.f32.mxu0 %vm3491_vm2, %v3492_v21 }
 0x458   :  { %3258 = vmatprep.subr.bf16.mxu0 %v3490_v9  ;;  %3263 = vmatpush3.bf16.msra.mxu1 %v3629_v7 }
 0x459   :  { %3264 = vmatprep.subr.bf16.mxu1 %v3490_v9  ;;  %3058 = vmatprep.mubr.msk.f32.mxu1 %vm3491_vm2, %v3492_v21 }
 0x45b   :  { %3260 = vmatpush3.bf16.msra.mxu0 %v3728_v31 }
 0x45c   :  { %3267 = vmatprep.subr.bf16.mxu0 %v3490_v9  ;;  %3266 = vmatpush3.bf16.msra.mxu1 %v3649_v13 }
 0x45d   :  { %3273 = vmatprep.subr.bf16.mxu1 %v3490_v9 }
 0x45e   :  { %3048 = vmatmul.mubr.msk.f32.vlgmr.msra.gmra.mrb[28].mxu0 %vm237_vm3, %v1469_v19 }
 0x45f   :  { %3269 = vmatpush3.bf16.msra.mxu0 %v3691_v22  ;;  %3069 = vmatprep.mubr.msk.f32.mxu0 %vm3491_vm2, %v3492_v21 }
 0x460   :  { %3270 = vmatprep.subr.bf16.mxu0 %v3490_v9 }
 0x463   :  { %3272 = vmatpush3.bf16.msra.mxu0 %v3711_v28 }
 0x464   :  { %3279 = vmatprep.subr.bf16.mxu0 %v3490_v9 }
 0x529   :  { %v1545_v23 = vpop.f32.mrb[26].mxu0  ;;  %v1615_v24 = vpop.f32.mrb[22].mxu1 }
 0x52a   :  { %v1619_v25 = vadd.f32 %v1545_v23, %v1471_v20  ;;  %v3027_v26 = vpop.f32.mrb[27].mxu0  ;;  %v3038_v29 = vpop.f32.mrb[23].mxu1  ;;  %v1626_v33 = vadd.f32 %v1615_v24, %v1473_v32 }
 0x52b   :  { %v1953_v26 = vld [vmem:[#allocation3 + $0x30] sm:$0xff] }
 0x52c   :  { %v2663_v30 = vmul.f32 -1.442695, %v1619_v25  ;;  %v2664_v34 = vmul.f32 -1.442695, %v1626_v33 }
 0x52e   :  { %3373 = vpow2.f32 %v2663_v30 }
 0x52f   :  { %3375 = vpow2.f32 %v2664_v34 }
 0x531   :  { %v1699_v35 = vpop.f32.mrb[28].mxu0 }
 0x532   :  { %v3049_v36 = vpop.f32.mrb[29].mxu0  ;;  %v1700_v42 = vadd.f32 %v3790_v41, %v1699_v35 }
 0x538   :  { %v3374_v37 = vpop.eup %3373 }
 0x539   :  { %v1623_v38 = vadd.f32 1.0, %v3374_v37  ;;  %v3376_v39 = vpop.eup %3375 }
 0x53a   :  { %v1630_v40 = vadd.f32 1.0, %v3376_v39  ;;  %v1955_v39 = vld [vmem:[#allocation4 + $0x30] sm:$0xff] }
 0x53b   :  { %3377 = vrcp.f32 %v1623_v38 }
 0x53c   :  { %3379 = vrcp.f32 %v1630_v40 }
 0x545   :  { %v3378_v43 = vpop.eup %3377 }
 0x546   :  { %v1703_v44 = vmul.f32 %v3378_v43, %v1700_v42  ;;  %v3380_v47 = vpop.eup %3379 }
 0x547   :  { %v1706_v48 = vsub.f32 1.0, %v3380_v47  ;;  %v1708_v51 = vmul.f32 %v3380_v47, %v1469_v19 }
 0x548   :  { %v1704_v46 = vadd.f32 %v1703_v44, %v1475_v45 }
 0x54a   :  { %3381 = vtanh.f32 %v1704_v46 }
 0x554   :  { %v3382_v49 = vpop.eup %3381 }
 0x555   :  { %v1707_v50 = vmul.f32 %v3382_v49, %v1706_v48  ;;  %v2431_v48 = vld [vmem:[%s3984_s11 + $0x8] sm:$0xff]  ;;  %v2432_v49 = vld [vmem:[%s3984_s11 + $0x10] sm:$0xff] }
 0x557   :  { %v1709_v52 = vadd.f32 %v1708_v51, %v1707_v50  ;;  %v2433_v50 = vld [vmem:[%s3984_s11 + $0x18] sm:$0xff] }
 0x558   :  { %v3319_v51 = vpack.c.bf16 %v2433_v50, %v2432_v49 }
 0x559   :  { %3059 = vmatmul.mubr.msk.f32.vlgmr.msra.gmra.mrb[24].mxu1 %vm237_vm3, %v1709_v52  ;;  %3070 = vmatmul.mubr.msk.f32.vlgmr.msra.gmra.mrb[30].mxu0 %vm237_vm3, %v1709_v52 }
 0x55a   :  { %3275 = vmatpush3.bf16.msra.mxu1 %v3708_v27  ;;  %3080 = vmatprep.mubr.msk.f32.mxu1 %vm3491_vm2, %v3492_v21 }
 0x55b   :  { %3276 = vmatprep.subr.bf16.mxu1 %v3490_v9  ;;  %3281 = vmatpush3.bf16.msra.mxu0 %v3629_v7 }
 0x55c   :  { %3282 = vmatprep.subr.bf16.mxu0 %v3490_v9  ;;  %3091 = vmatprep.mubr.msk.f32.mxu0 %vm3491_vm2, %v3492_v21 }
 0x55e   :  { %3278 = vmatpush3.bf16.msra.mxu1 %v3728_v31 }
 0x55f   :  { %3285 = vmatprep.subr.bf16.mxu1 %v3490_v9  ;;  %3284 = vmatpush3.bf16.msra.mxu0 %v3649_v13 }
 0x560   :  { %3291 = vmatprep.subr.bf16.mxu0 %v3490_v9 }
 0x561   :  { %3081 = vmatmul.mubr.msk.f32.vlgmr.msra.gmra.mrb[26].mxu1 %vm237_vm3, %v1709_v52 }
 0x562   :  { %3287 = vmatpush3.bf16.msra.mxu1 %v3691_v22  ;;  %3102 = vmatprep.mubr.msk.f32.mxu1 %vm3491_vm2, %v3492_v21 }
 0x563   :  { %3288 = vmatprep.subr.bf16.mxu1 %v3490_v9 }
 0x566   :  { %3290 = vmatpush3.bf16.msra.mxu1 %v3711_v28 }
 0x567   :  { %3297 = vmatprep.subr.bf16.mxu1 %v3490_v9 }
 0x62c   :  { %v1785_v54 = vpop.f32.mrb[24].mxu1  ;;  %v1855_v55 = vpop.f32.mrb[30].mxu0 }
 0x62d   :  { %v1859_v56 = vadd.f32 %v1785_v54, %v1711_v53  ;;  %v3060_v57 = vpop.f32.mrb[25].mxu1  ;;  %v3071_v58 = vpop.f32.mrb[31].mxu0  ;;  %v1866_v61 = vadd.f32 %v1855_v55, %v1713_v60  ;;  %v2191_v54 = vld [vmem:[#allocation2 + $0x38] sm:$0xff] }
 0x62f   :  { %v2668_v59 = vmul.f32 -1.442695, %v1859_v56  ;;  %v2669_v62 = vmul.f32 -1.442695, %v1866_v61  ;;  %v2193_v61 = vld [vmem:[#allocation3 + $0x38] sm:$0xff] }
 0x631   :  { %3383 = vpow2.f32 %v2668_v59 }
 0x632   :  { %3385 = vpow2.f32 %v2669_v62 }
 0x634   :  { %v1939_v63 = vpop.f32.mrb[26].mxu1 }
 0x635   :  { %v3082_v0 = vpop.f32.mrb[27].mxu1  ;;  %v1940_v5 = vadd.f32 %v3790_v41, %v1939_v63 }
 0x63b   :  { %v3384_v1 = vpop.eup %3383 }
 0x63c   :  { %v1863_v2 = vadd.f32 1.0, %v3384_v1  ;;  %v3386_v3 = vpop.eup %3385 }
 0x63d   :  { %v1870_v4 = vadd.f32 1.0, %v3386_v3 }
 0x63e   :  { %3387 = vrcp.f32 %v1863_v2 }
 0x63f   :  { %3389 = vrcp.f32 %v1870_v4 }
 0x648   :  { %v3388_v6 = vpop.eup %3387 }
 0x649   :  { %v1943_v8 = vmul.f32 %v3388_v6, %v1940_v5  ;;  %v3390_v12 = vpop.eup %3389 }
 0x64a   :  { %v1946_v14 = vsub.f32 1.0, %v3390_v12  ;;  %v1948_v17 = vmul.f32 %v3390_v12, %v1709_v52  ;;  %v2516_v52 = vld [vmem:[%s3986_s13 + $0x8] sm:$0xff] }
 0x64b   :  { %v1944_v11 = vadd.f32 %v1943_v8, %v1715_v10  ;;  %v2195_v10 = vld [vmem:[#allocation4 + $0x38] sm:$0xff] }
 0x64d   :  { %3391 = vtanh.f32 %v1944_v11 }
 0x657   :  { %v3392_v15 = vpop.eup %3391 }
 0x658   :  { %v1947_v16 = vmul.f32 %v3392_v15, %v1946_v14 }
 0x65a   :  { %v1949_v18 = vadd.f32 %v1948_v17, %v1947_v16 }
 0x65c   :  { %3092 = vmatmul.mubr.msk.f32.vlgmr.msra.gmra.mrb[32].mxu0 %vm237_vm3, %v1949_v18  ;;  %3103 = vmatmul.mubr.msk.f32.vlgmr.msra.gmra.mrb[28].mxu1 %vm237_vm3, %v1949_v18 }
 0x65d   :  { %3293 = vmatpush3.bf16.msra.mxu0 %v3708_v27  ;;  %3113 = vmatprep.mubr.msk.f32.mxu0 %vm3491_vm2, %v3492_v21 }
 0x65e   :  { %3294 = vmatprep.subr.bf16.mxu0 %v3490_v9  ;;  %3299 = vmatpush3.bf16.msra.mxu1 %v3629_v7  ;;  %v1951_v7 = vld [vmem:[#allocation2 + $0x30] sm:$0xff] }
 0x65f   :  { %3300 = vmatprep.subr.bf16.mxu1 %v3490_v9  ;;  %3124 = vmatprep.mubr.msk.f32.mxu1 %vm3491_vm2, %v3492_v21 }
 0x661   :  { %3296 = vmatpush3.bf16.msra.mxu0 %v3728_v31 }
 0x662   :  { %3303 = vmatprep.subr.bf16.mxu0 %v3490_v9  ;;  %3302 = vmatpush3.bf16.msra.mxu1 %v3649_v13 }
 0x663   :  { %3309 = vmatprep.subr.bf16.mxu1 %v3490_v9 }
 0x664   :  { %3114 = vmatmul.mubr.msk.f32.vlgmr.msra.gmra.mrb[34].mxu0 %vm237_vm3, %v1949_v18 }
 0x665   :  { %3305 = vmatpush3.bf16.msra.mxu0 %v3691_v22  ;;  %3135 = vmatprep.mubr.msk.f32.mxu0 %vm3491_vm2, %v3492_v21 }
 0x666   :  { %3306 = vmatprep.subr.bf16.mxu0 %v3490_v9 }
 0x669   :  { %3308 = vmatpush3.bf16.msra.mxu0 %v3711_v28 }
 0x66a   :  { %3315 = vmatprep.subr.bf16.mxu0 %v3490_v9 }
 0x72f   :  { %v2025_v19 = vpop.f32.mrb[32].mxu0  ;;  %v2095_v20 = vpop.f32.mrb[28].mxu1 }
 0x730   :  { %v2099_v23 = vadd.f32 %v2025_v19, %v1951_v7  ;;  %v3093_v13 = vpop.f32.mrb[33].mxu0  ;;  %v3104_v24 = vpop.f32.mrb[29].mxu1  ;;  %v2106_v29 = vadd.f32 %v2095_v20, %v1953_v26  ;;  %v2517_v7 = vld [vmem:[%s3986_s13 + $0x10] sm:$0xff]  ;;  %v2681_v20 = vld [vmem:[%s3985_s12] ss:$0 sm:$0xff] }
 0x731   :  { %v2683_v26 = vld [vmem:[#allocation5] ss:$0 sm:$0xff] }
 0x732   :  { %v2673_v25 = vmul.f32 -1.442695, %v2099_v23  ;;  %v2674_v22 = vmul.f32 -1.442695, %v2106_v29 }
 0x734   :  { %3393 = vpow2.f32 %v2673_v25 }
 0x735   :  { %3395 = vpow2.f32 %v2674_v22 }
 0x737   :  { %v2179_v30 = vpop.f32.mrb[34].mxu0 }
 0x738   :  { %v3115_v32 = vpop.f32.mrb[35].mxu0  ;;  %v2180_v36 = vadd.f32 %v3790_v41, %v2179_v30 }
 0x73e   :  { %v3394_v33 = vpop.eup %3393 }
 0x73f   :  { %v2103_v34 = vadd.f32 1.0, %v3394_v33  ;;  %v3396_v28 = vpop.eup %3395 }
 0x740   :  { %v2110_v35 = vadd.f32 1.0, %v3396_v28 }
 0x741   :  { %3397 = vrcp.f32 %v2103_v34 }
 0x742   :  { %3399 = vrcp.f32 %v2110_v35 }
 0x74b   :  { %v3398_v37 = vpop.eup %3397 }
 0x74c   :  { %v2183_v38 = vmul.f32 %v3398_v37, %v2180_v36  ;;  %v3400_v42 = vpop.eup %3399 }
 0x74d   :  { %v2186_v43 = vsub.f32 1.0, %v3400_v42  ;;  %v2188_v46 = vmul.f32 %v3400_v42, %v1949_v18 }
 0x74e   :  { %v2184_v40 = vadd.f32 %v2183_v38, %v1955_v39 }
 0x750   :  { %3401 = vtanh.f32 %v2184_v40 }
 0x75a   :  { %v3402_v44 = vpop.eup %3401 }
 0x75b   :  { %v2187_v45 = vmul.f32 %v3402_v44, %v2186_v43 }
 0x75d   :  { %v2189_v47 = vadd.f32 %v2188_v46, %v2187_v45 }
 0x75f   :  { %3125 = vmatmul.mubr.msk.f32.vlgmr.msra.gmra.mrb[30].mxu1 %vm237_vm3, %v2189_v47  ;;  %3136 = vmatmul.mubr.msk.f32.vlgmr.msra.gmra.mrb[36].mxu0 %vm237_vm3, %v2189_v47 }
 0x760   :  { %3311 = vmatpush3.bf16.msra.mxu1 %v3708_v27  ;;  %3146 = vmatprep.mubr.msk.f32.mxu1 %vm3491_vm2, %v3492_v21  ;;  %v2430_v27 = vld [vmem:[%s3984_s11] sm:$0xff] }
 0x761   :  { %3312 = vmatprep.subr.bf16.mxu1 %v3490_v9  ;;  %3157 = vmatprep.mubr.msk.f32.mxu0 %vm3491_vm2, %v3492_v21 }
 0x764   :  { %3314 = vmatpush3.bf16.msra.mxu1 %v3728_v31  ;;  %v3316_v31 = vpack.c.bf16 %v2431_v48, %v2430_v27 }
 0x765   :  { %3321 = vmatprep.subr.bf16.mxu1 %v3490_v9 }
 0x766   :  { %3317 = vmatpush3.bf16.msra.mxu0 %v3316_v31 }
 0x767   :  { %3147 = vmatmul.mubr.msk.f32.vlgmr.msra.gmra.mrb[32].mxu1 %vm237_vm3, %v2189_v47  ;;  %3318 = vmatprep.subr.bf16.mxu0 %v3490_v9 }
 0x768   :  { %3168 = vmatprep.mubr.msk.f32.mxu1 %vm3491_vm2, %v3492_v21  ;;  %v2515_v21 = vld [vmem:[%s3986_s13] sm:$0xff] }
 0x769   :  { %v3322_v53 = vpack.c.bf16 %v2516_v52, %v2515_v21 }
 0x76a   :  { %3320 = vmatpush3.bf16.msra.mxu0 %v3319_v51 }
 0x76b   :  { %3323 = vmatpush3.bf16.msra.mxu1 %v3322_v53 }
 0x76c   :  { %3324 = vmatprep.subr.bf16.mxu1 %v3490_v9 }
 0x832   :  { %v2265_v55 = vpop.f32.mrb[30].mxu1  ;;  %v2335_v56 = vpop.f32.mrb[36].mxu0 }
 0x833   :  { %v2339_v57 = vadd.f32 %v2265_v55, %v2191_v54  ;;  %v3126_v58 = vpop.f32.mrb[31].mxu1  ;;  %v3137_v59 = vpop.f32.mrb[37].mxu0  ;;  %v2346_v62 = vadd.f32 %v2335_v56, %v2193_v61 }
 0x835   :  { %v2678_v60 = vmul.f32 -1.442695, %v2339_v57  ;;  %v2679_v63 = vmul.f32 -1.442695, %v2346_v62 }
 0x837   :  { %3403 = vpow2.f32 %v2678_v60 }
 0x838   :  { %3405 = vpow2.f32 %v2679_v63 }
 0x83a   :  { %v2419_v0 = vpop.f32.mrb[32].mxu1 }
 0x83b   :  { %v3148_v1 = vpop.f32.mrb[33].mxu1  ;;  %v2420_v9 = vadd.f32 %v3790_v41, %v2419_v0  ;;  %v2518_v41 = vld [vmem:[%s3986_s13 + $0x18] sm:$0xff] }
 0x83c   :  { %v3325_v19 = vpack.c.bf16 %v2518_v41, %v2517_v7 }
 0x83e   :  { %3326 = vmatpush3.bf16.msra.mxu1 %v3325_v19 }
 0x841   :  { %v3404_v2 = vpop.eup %3403 }
 0x842   :  { %v2343_v3 = vadd.f32 1.0, %v3404_v2  ;;  %v3406_v4 = vpop.eup %3405 }
 0x843   :  { %v2350_v5 = vadd.f32 1.0, %v3406_v4 }
 0x844   :  { %3407 = vrcp.f32 %v2343_v3 }
 0x845   :  { %3409 = vrcp.f32 %v2350_v5 }
 0x84e   :  { %v3408_v6 = vpop.eup %3407 }
 0x84f   :  { %v2423_v8 = vmul.f32 %v3408_v6, %v2420_v9  ;;  %v3410_v12 = vpop.eup %3409 }
 0x850   :  { %v2426_v14 = vsub.f32 1.0, %v3410_v12  ;;  %v2428_v17 = vmul.f32 %v3410_v12, %v2189_v47 }
 0x851   :  { %v2424_v11 = vadd.f32 %v2423_v8, %v2195_v10 }
 0x853   :  { %3411 = vtanh.f32 %v2424_v11 }
 0x85d   :  { %v3412_v15 = vpop.eup %3411 }
 0x85e   :  { %v2427_v16 = vmul.f32 %v3412_v15, %v2426_v14 }
 0x860   :  { %v2429_v18 = vadd.f32 %v2428_v17, %v2427_v16 }
 0x862   :  { %3158 = vmatmul.mubr.msk.f32.vlgmr.msra.gmra.mrb[38].mxu0 %vm237_vm3, %v2429_v18 }
 0x935   :  { %v2510_v23 = vpop.f32.mrb[38].mxu0 }
 0x936   :  { %v2511_v13 = vadd.f32 %v2681_v20, %v2510_v23  ;;  %v3159_v24 = vpop.f32.mrb[39].mxu0 }
 0x938   :  { %v2514_v25 = vmax.f32 %v2511_v13, 0.0 }
 0x93a   :  { %3169 = vmatmul.mubr.msk.f32.vlgmr.msra.gmra.mrb[34].mxu1 %vm237_vm3, %v2514_v25 }
 0xa0d   :  { %v2595_v29 = vpop.f32.mrb[34].mxu1 }
 0xa0e   :  { %v2596_v22 = vadd.f32 %v2683_v26, %v2595_v29  ;;  %v3170_v30 = vpop.f32.mrb[35].mxu1 }
 0xa10   :  { %v2685_v32 = vmul.f32 -1.442695, %v2596_v22 }
 0xa12   :  { %3413 = vpow2.f32 %v2685_v32 }
 0xa1c   :  { %v3414_v33 = vpop.eup %3413 }
 0xa1d   :  { %v2602_v34 = vadd.f32 1.0, %v3414_v33 }
 0xa1f   :  { %3415 = vrcp.f32 %v2602_v34 }
 0xa29   :  { %v3416_v28 = vpop.eup %3415 }
 0xa2a   :  { %2606 = vst.msk [vmem:[%s3988_s15] sm:$0xff] %vm2605_vm4, %v3416_v28 }
 0xa2b   :  { %2611 = vsyncpa [#allocation7], 1 }
 0xa2c   :  { %2612 = vsyncpa [#allocation9], 1 }

</bundles_post_ra>
